<compile_context>
chip_gen: v7x
topology: tpu7x:2x2x1
jax: 0.10.0
libtpu: 0.0.40
codegen_flags: <defaults>
</compile_context>

<pallas_src>
import math

import jax
import jax.numpy as jnp
from jax.experimental import pallas as pl
from jax.experimental.pallas import tpu as pltpu


# ------------------------------ fused kernel ------------------------------ #
def _build_fused_call(IC1, OC1, OC2, KH, KW, H, W, NT, Npad):
    """pallas_call computing t2(t1(x)) for a lane-padded batch.

    Inputs (batch-in-lanes layout):
      x    : (IC1, H+2(KH-1), W+2(KW-1), Npad)  spatially zero-padded
      w1f  : (IC1*OC1*KH*KW,)  b1: (OC1,)   w2f: (OC1*OC2*KH*KW,)  b2: (OC2,)
    Output: (OC2, OH2, OW2, Npad)
    """
    OH1, OW1 = H + KH - 1, W + KW - 1              # layer-1 output spatial dims
    OH2, OW2 = OH1 + KH - 1, OW1 + KW - 1          # layer-2 output spatial dims
    PH1, PW1 = OH1 + 2 * (KH - 1), OW1 + 2 * (KW - 1)   # padded layer-1 output
    PXH, PXW = H + 2 * (KH - 1), W + 2 * (KW - 1)       # padded input

    def kernel(w1_ref, b1_ref, w2_ref, b2_ref, x_ref, out_ref, y1p_ref):
        # ---- hoist every scalar weight / bias out of the unrolled loops ----
        w1 = [w1_ref[i] for i in range(IC1 * OC1 * KH * KW)]
        b1 = [b1_ref[i] for i in range(OC1)]
        w2 = [w2_ref[i] for i in range(OC1 * OC2 * KH * KW)]
        b2 = [b2_ref[i] for i in range(OC2)]

        # Transposed conv == correlation with a spatially flipped kernel.
        def w1_flip(ic, oc, a, b):
            return w1[((ic * OC1 + oc) * KH + (KH - 1 - a)) * KW + (KW - 1 - b)]

        def w2_flip(ic, oc, a, b):
            return w2[((ic * OC2 + oc) * KH + (KH - 1 - a)) * KW + (KW - 1 - b)]

        # ------- layer 1: ConvTranspose2d(IC1 -> OC1), register accumulation
        acc1 = [None] * OC1
        for a in range(KH):
            for b in range(KW):
                xs = [x_ref[ic, a:a + OH1, b:b + OW1, :] for ic in range(IC1)]
                for oc in range(OC1):
                    c = xs[0] * w1_flip(0, oc, a, b)
                    for ic in range(1, IC1):
                        c = c + xs[ic] * w1_flip(ic, oc, a, b)
                    acc1[oc] = c if acc1[oc] is None else acc1[oc] + c

        # Materialize the zero-padded layer-1 output (halo of KH-1/KW-1 zeros)
        # in a tiny VMEM scratch so layer 2 is again plain static-slice reads.
        y1p_ref[...] = jnp.zeros((OC1, PH1, PW1, NT), jnp.float32)
        for oc in range(OC1):
            y1p_ref[oc, KH - 1:KH - 1 + OH1, KW - 1:KW - 1 + OW1, :] = (
                acc1[oc] + b1[oc])

        # ------- layer 2: ConvTranspose2d(OC1 -> OC2), register accumulation
        acc2 = [None] * OC2
        for a in range(KH):
            for b in range(KW):
                ys = [y1p_ref[ic, a:a + OH2, b:b + OW2, :] for ic in range(OC1)]
                for oc in range(OC2):
                    c = ys[0] * w2_flip(0, oc, a, b)
                    for ic in range(1, OC1):
                        c = c + ys[ic] * w2_flip(ic, oc, a, b)
                    acc2[oc] = c if acc2[oc] is None else acc2[oc] + c

        # One lane-dense store per output channel.
        for oc in range(OC2):
            out_ref[oc] = acc2[oc] + b2[oc]

    smem = pl.BlockSpec(memory_space=pltpu.MemorySpace.SMEM)
    return pl.pallas_call(
        kernel,
        out_shape=jax.ShapeDtypeStruct((OC2, OH2, OW2, Npad), jnp.float32),
        grid=(Npad // NT,),
        in_specs=[smem, smem, smem, smem,
                  pl.BlockSpec((IC1, PXH, PXW, NT), lambda n: (0, 0, 0, n))],
        out_specs=pl.BlockSpec((OC2, OH2, OW2, NT), lambda n: (0, 0, 0, n)),
        scratch_shapes=[pltpu.VMEM((OC1, PH1, PW1, NT), jnp.float32)],
        compiler_params=pltpu.CompilerParams(
            dimension_semantics=("parallel",)),
    )


# ----------------------------- model forward ------------------------------ #
def make_model_forward(IC1, OC1, OC2, KH, KW, batch_tile=128):
    @jax.jit
    def forward(x, w1f, b1, w2f, b2):
        N, IC, H, W = x.shape
        NT = batch_tile
        Npad = ((N + NT - 1) // NT) * NT
        # Batch-in-lanes layout + spatial zero halo for the correlation form.
        xt = jnp.transpose(x, (1, 2, 3, 0)).astype(jnp.float32)
        xt = jnp.pad(xt, ((0, 0), (KH - 1, KH - 1), (KW - 1, KW - 1),
                          (0, Npad - N)))
        call = _build_fused_call(IC1, OC1, OC2, KH, KW, H, W, NT, Npad)
        out = call(w1f, b1, w2f, b2, xt)           # (OC2, OH2, OW2, Npad)
        return jnp.transpose(out, (3, 0, 1, 2))[:N]

    return forward


# ----------------------------- parameter init ----------------------------- #
def init_params(key):
    # Deterministic init mimicking PyTorch's default U(-1/sqrt(fan), 1/sqrt(fan)).
    k1, k2, k3, k4 = jax.random.split(key, 4)

    def uniform(k, shape, fan):
        bound = 1.0 / math.sqrt(fan)
        return jax.random.uniform(k, shape, jnp.float32, -bound, bound)

    # t1: ConvTranspose2d(3, 2, kernel_size=2) -> weight (3, 2, 2, 2)
    w1 = uniform(k1, (3, 2, 2, 2), 2 * 2 * 2)
    b1 = uniform(k2, (2,), 2 * 2 * 2)
    # t2: ConvTranspose2d(2, 3, kernel_size=2) -> weight (2, 3, 2, 2)
    w2 = uniform(k3, (2, 3, 2, 2), 3 * 2 * 2)
    b2 = uniform(k4, (3,), 3 * 2 * 2)
    return {"w1": w1, "b1": b1, "w2": w2, "b2": b2}


def prepare_params(params):
    """One-time weight preprocessing (hoisted out of the forward path)."""
    return {
        "w1f": params["w1"].reshape(-1),   # (IC1*OC1*KH*KW,), row-major
        "b1": params["b1"],
        "w2f": params["w2"].reshape(-1),   # (OC1*OC2*KH*KW,), row-major
        "b2": params["b2"],
    }


# ------------------------- independent reference --------------------------- #
def _ref_conv_transpose2d(x, w, b):
    N, IC, H, W = x.shape
    _, OC, KH, KW = w.shape
    OH, OW = H + KH - 1, W + KW - 1
    y = jnp.zeros((N, OC, OH, OW), jnp.float32)
    for kh in range(KH):
        for kw in range(KW):
            contrib = jnp.einsum("nchw,co->nohw", x, w[:, :, kh, kw])
            y = y.at[:, :, kh:kh + H, kw:kw + W].add(contrib)
    return y + b[None, :, None, None]


def _ref_forward(x, p):
    return _ref_conv_transpose2d(
        _ref_conv_transpose2d(x, p["w1"], p["b1"]), p["w2"], p["b2"]
    )


if __name__ == "__main__":
    key = jax.random.PRNGKey(0)
    kx, kp = jax.random.split(key)

    # Small batch consistent with the module (spec input was (1, 3, 3, 3)).
    x = jax.random.normal(kx, (2, 3, 3, 3), jnp.float32)
    params = init_params(kp)
    prepared = prepare_params(params)

    fwd = make_model_forward(IC1=3, OC1=2, OC2=3, KH=2, KW=2)
    out = fwd(x, prepared["w1f"], prepared["b1"], prepared["w2f"], prepared["b2"])
    out = jax.block_until_ready(out)
    assert out.shape == (2, 3, 5, 5), out.shape

    ref = jax.block_until_ready(_ref_forward(x, params))
    assert jnp.allclose(out, ref, atol=1e-5, rtol=1e-5), \
        float(jnp.max(jnp.abs(out - ref)))

    print("KERNEL_OK")
</pallas_src>

<mosaic_0001>
module attributes {stable_mosaic.version = 11 : i64} {
  func.func @kernel(%arg0: i32, %arg1: memref<24xf32, #tpu.memory_space<smem>>, %arg2: memref<2xf32, #tpu.memory_space<smem>>, %arg3: memref<24xf32, #tpu.memory_space<smem>>, %arg4: memref<3xf32, #tpu.memory_space<smem>>, %arg5: memref<3x5x5x128xf32, #tpu.memory_space<vmem>>, %arg6: memref<3x5x5x128xf32, #tpu.memory_space<vmem>>, %arg7: memref<2x6x6x128xf32, #tpu.memory_space<vmem>>) attributes {dimension_semantics = [#tpu.dimension_semantics<parallel>], iteration_bounds = array<i64: 1>, scalar_prefetch = 0 : i64, scratch_operands = 1 : i64, tpu.core_type = #tpu.core_type<tc>, window_params = [{transform_indices = @transform_0, window_bounds = array<i64: 24>}, {transform_indices = @transform_1, window_bounds = array<i64: 2>}, {transform_indices = @transform_2, window_bounds = array<i64: 24>}, {transform_indices = @transform_3, window_bounds = array<i64: 3>}, {transform_indices = @transform_4, window_bounds = array<i64: 3, 5, 5, 128>}, {transform_indices = @transform_5, window_bounds = array<i64: 3, 5, 5, 128>}]} {
    %c0 = arith.constant 0 : index
    %0 = memref.load %arg1[%c0] : memref<24xf32, #tpu.memory_space<smem>>
    %c1 = arith.constant 1 : index
    %1 = memref.load %arg1[%c1] : memref<24xf32, #tpu.memory_space<smem>>
    %c2 = arith.constant 2 : index
    %2 = memref.load %arg1[%c2] : memref<24xf32, #tpu.memory_space<smem>>
    %c3 = arith.constant 3 : index
    %3 = memref.load %arg1[%c3] : memref<24xf32, #tpu.memory_space<smem>>
    %c4 = arith.constant 4 : index
    %4 = memref.load %arg1[%c4] : memref<24xf32, #tpu.memory_space<smem>>
    %c5 = arith.constant 5 : index
    %5 = memref.load %arg1[%c5] : memref<24xf32, #tpu.memory_space<smem>>
    %c6 = arith.constant 6 : index
    %6 = memref.load %arg1[%c6] : memref<24xf32, #tpu.memory_space<smem>>
    %c7 = arith.constant 7 : index
    %7 = memref.load %arg1[%c7] : memref<24xf32, #tpu.memory_space<smem>>
    %c8 = arith.constant 8 : index
    %8 = memref.load %arg1[%c8] : memref<24xf32, #tpu.memory_space<smem>>
    %c9 = arith.constant 9 : index
    %9 = memref.load %arg1[%c9] : memref<24xf32, #tpu.memory_space<smem>>
    %c10 = arith.constant 10 : index
    %10 = memref.load %arg1[%c10] : memref<24xf32, #tpu.memory_space<smem>>
    %c11 = arith.constant 11 : index
    %11 = memref.load %arg1[%c11] : memref<24xf32, #tpu.memory_space<smem>>
    %c12 = arith.constant 12 : index
    %12 = memref.load %arg1[%c12] : memref<24xf32, #tpu.memory_space<smem>>
    %c13 = arith.constant 13 : index
    %13 = memref.load %arg1[%c13] : memref<24xf32, #tpu.memory_space<smem>>
    %c14 = arith.constant 14 : index
    %14 = memref.load %arg1[%c14] : memref<24xf32, #tpu.memory_space<smem>>
    %c15 = arith.constant 15 : index
    %15 = memref.load %arg1[%c15] : memref<24xf32, #tpu.memory_space<smem>>
    %c16 = arith.constant 16 : index
    %16 = memref.load %arg1[%c16] : memref<24xf32, #tpu.memory_space<smem>>
    %c17 = arith.constant 17 : index
    %17 = memref.load %arg1[%c17] : memref<24xf32, #tpu.memory_space<smem>>
    %c18 = arith.constant 18 : index
    %18 = memref.load %arg1[%c18] : memref<24xf32, #tpu.memory_space<smem>>
    %c19 = arith.constant 19 : index
    %19 = memref.load %arg1[%c19] : memref<24xf32, #tpu.memory_space<smem>>
    %c20 = arith.constant 20 : index
    %20 = memref.load %arg1[%c20] : memref<24xf32, #tpu.memory_space<smem>>
    %c21 = arith.constant 21 : index
    %21 = memref.load %arg1[%c21] : memref<24xf32, #tpu.memory_space<smem>>
    %c22 = arith.constant 22 : index
    %22 = memref.load %arg1[%c22] : memref<24xf32, #tpu.memory_space<smem>>
    %c23 = arith.constant 23 : index
    %23 = memref.load %arg1[%c23] : memref<24xf32, #tpu.memory_space<smem>>
    %c0_0 = arith.constant 0 : index
    %24 = memref.load %arg2[%c0_0] : memref<2xf32, #tpu.memory_space<smem>>
    %c1_1 = arith.constant 1 : index
    %25 = memref.load %arg2[%c1_1] : memref<2xf32, #tpu.memory_space<smem>>
    %c0_2 = arith.constant 0 : index
    %26 = memref.load %arg3[%c0_2] : memref<24xf32, #tpu.memory_space<smem>>
    %c1_3 = arith.constant 1 : index
    %27 = memref.load %arg3[%c1_3] : memref<24xf32, #tpu.memory_space<smem>>
    %c2_4 = arith.constant 2 : index
    %28 = memref.load %arg3[%c2_4] : memref<24xf32, #tpu.memory_space<smem>>
    %c3_5 = arith.constant 3 : index
    %29 = memref.load %arg3[%c3_5] : memref<24xf32, #tpu.memory_space<smem>>
    %c4_6 = arith.constant 4 : index
    %30 = memref.load %arg3[%c4_6] : memref<24xf32, #tpu.memory_space<smem>>
    %c5_7 = arith.constant 5 : index
    %31 = memref.load %arg3[%c5_7] : memref<24xf32, #tpu.memory_space<smem>>
    %c6_8 = arith.constant 6 : index
    %32 = memref.load %arg3[%c6_8] : memref<24xf32, #tpu.memory_space<smem>>
    %c7_9 = arith.constant 7 : index
    %33 = memref.load %arg3[%c7_9] : memref<24xf32, #tpu.memory_space<smem>>
    %c8_10 = arith.constant 8 : index
    %34 = memref.load %arg3[%c8_10] : memref<24xf32, #tpu.memory_space<smem>>
    %c9_11 = arith.constant 9 : index
    %35 = memref.load %arg3[%c9_11] : memref<24xf32, #tpu.memory_space<smem>>
    %c10_12 = arith.constant 10 : index
    %36 = memref.load %arg3[%c10_12] : memref<24xf32, #tpu.memory_space<smem>>
    %c11_13 = arith.constant 11 : index
    %37 = memref.load %arg3[%c11_13] : memref<24xf32, #tpu.memory_space<smem>>
    %c12_14 = arith.constant 12 : index
    %38 = memref.load %arg3[%c12_14] : memref<24xf32, #tpu.memory_space<smem>>
    %c13_15 = arith.constant 13 : index
    %39 = memref.load %arg3[%c13_15] : memref<24xf32, #tpu.memory_space<smem>>
    %c14_16 = arith.constant 14 : index
    %40 = memref.load %arg3[%c14_16] : memref<24xf32, #tpu.memory_space<smem>>
    %c15_17 = arith.constant 15 : index
    %41 = memref.load %arg3[%c15_17] : memref<24xf32, #tpu.memory_space<smem>>
    %c16_18 = arith.constant 16 : index
    %42 = memref.load %arg3[%c16_18] : memref<24xf32, #tpu.memory_space<smem>>
    %c17_19 = arith.constant 17 : index
    %43 = memref.load %arg3[%c17_19] : memref<24xf32, #tpu.memory_space<smem>>
    %c18_20 = arith.constant 18 : index
    %44 = memref.load %arg3[%c18_20] : memref<24xf32, #tpu.memory_space<smem>>
    %c19_21 = arith.constant 19 : index
    %45 = memref.load %arg3[%c19_21] : memref<24xf32, #tpu.memory_space<smem>>
    %c20_22 = arith.constant 20 : index
    %46 = memref.load %arg3[%c20_22] : memref<24xf32, #tpu.memory_space<smem>>
    %c21_23 = arith.constant 21 : index
    %47 = memref.load %arg3[%c21_23] : memref<24xf32, #tpu.memory_space<smem>>
    %c22_24 = arith.constant 22 : index
    %48 = memref.load %arg3[%c22_24] : memref<24xf32, #tpu.memory_space<smem>>
    %c23_25 = arith.constant 23 : index
    %49 = memref.load %arg3[%c23_25] : memref<24xf32, #tpu.memory_space<smem>>
    %c0_26 = arith.constant 0 : index
    %50 = memref.load %arg4[%c0_26] : memref<3xf32, #tpu.memory_space<smem>>
    %c1_27 = arith.constant 1 : index
    %51 = memref.load %arg4[%c1_27] : memref<3xf32, #tpu.memory_space<smem>>
    %c2_28 = arith.constant 2 : index
    %52 = memref.load %arg4[%c2_28] : memref<3xf32, #tpu.memory_space<smem>>
    %c0_29 = arith.constant 0 : index
    %c0_30 = arith.constant 0 : index
    %c0_31 = arith.constant 0 : index
    %c0_32 = arith.constant 0 : index
    %53 = vector.load %arg5[%c0_29, %c0_30, %c0_31, %c0_32] : memref<3x5x5x128xf32, #tpu.memory_space<vmem>>, vector<1x4x4x128xf32>
    %54 = vector.shape_cast %53 : vector<1x4x4x128xf32> to vector<4x4x128xf32>
    %c1_33 = arith.constant 1 : index
    %c0_34 = arith.constant 0 : index
    %c0_35 = arith.constant 0 : index
    %c0_36 = arith.constant 0 : index
    %55 = vector.load %arg5[%c1_33, %c0_34, %c0_35, %c0_36] : memref<3x5x5x128xf32, #tpu.memory_space<vmem>>, vector<1x4x4x128xf32>
    %56 = vector.shape_cast %55 : vector<1x4x4x128xf32> to vector<4x4x128xf32>
    %c2_37 = arith.constant 2 : index
    %c0_38 = arith.constant 0 : index
    %c0_39 = arith.constant 0 : index
    %c0_40 = arith.constant 0 : index
    %57 = vector.load %arg5[%c2_37, %c0_38, %c0_39, %c0_40] : memref<3x5x5x128xf32, #tpu.memory_space<vmem>>, vector<1x4x4x128xf32>
    %58 = vector.shape_cast %57 : vector<1x4x4x128xf32> to vector<4x4x128xf32>
    %59 = vector.broadcast %3 : f32 to vector<4x4x128xf32>
    %60 = arith.mulf %54, %59 : vector<4x4x128xf32>
    %61 = vector.broadcast %11 : f32 to vector<4x4x128xf32>
    %62 = arith.mulf %56, %61 : vector<4x4x128xf32>
    %63 = arith.addf %60, %62 : vector<4x4x128xf32>
    %64 = vector.broadcast %19 : f32 to vector<4x4x128xf32>
    %65 = arith.mulf %58, %64 : vector<4x4x128xf32>
    %66 = arith.addf %63, %65 : vector<4x4x128xf32>
    %67 = vector.broadcast %7 : f32 to vector<4x4x128xf32>
    %68 = arith.mulf %54, %67 : vector<4x4x128xf32>
    %69 = vector.broadcast %15 : f32 to vector<4x4x128xf32>
    %70 = arith.mulf %56, %69 : vector<4x4x128xf32>
    %71 = arith.addf %68, %70 : vector<4x4x128xf32>
    %72 = vector.broadcast %23 : f32 to vector<4x4x128xf32>
    %73 = arith.mulf %58, %72 : vector<4x4x128xf32>
    %74 = arith.addf %71, %73 : vector<4x4x128xf32>
    %c0_41 = arith.constant 0 : index
    %c0_42 = arith.constant 0 : index
    %c1_43 = arith.constant 1 : index
    %c0_44 = arith.constant 0 : index
    %75 = vector.load %arg5[%c0_41, %c0_42, %c1_43, %c0_44] : memref<3x5x5x128xf32, #tpu.memory_space<vmem>>, vector<1x4x4x128xf32>
    %76 = vector.shape_cast %75 : vector<1x4x4x128xf32> to vector<4x4x128xf32>
    %c1_45 = arith.constant 1 : index
    %c0_46 = arith.constant 0 : index
    %c1_47 = arith.constant 1 : index
    %c0_48 = arith.constant 0 : index
    %77 = vector.load %arg5[%c1_45, %c0_46, %c1_47, %c0_48] : memref<3x5x5x128xf32, #tpu.memory_space<vmem>>, vector<1x4x4x128xf32>
    %78 = vector.shape_cast %77 : vector<1x4x4x128xf32> to vector<4x4x128xf32>
    %c2_49 = arith.constant 2 : index
    %c0_50 = arith.constant 0 : index
    %c1_51 = arith.constant 1 : index
    %c0_52 = arith.constant 0 : index
    %79 = vector.load %arg5[%c2_49, %c0_50, %c1_51, %c0_52] : memref<3x5x5x128xf32, #tpu.memory_space<vmem>>, vector<1x4x4x128xf32>
    %80 = vector.shape_cast %79 : vector<1x4x4x128xf32> to vector<4x4x128xf32>
    %81 = vector.broadcast %2 : f32 to vector<4x4x128xf32>
    %82 = arith.mulf %76, %81 : vector<4x4x128xf32>
    %83 = vector.broadcast %10 : f32 to vector<4x4x128xf32>
    %84 = arith.mulf %78, %83 : vector<4x4x128xf32>
    %85 = arith.addf %82, %84 : vector<4x4x128xf32>
    %86 = vector.broadcast %18 : f32 to vector<4x4x128xf32>
    %87 = arith.mulf %80, %86 : vector<4x4x128xf32>
    %88 = arith.addf %85, %87 : vector<4x4x128xf32>
    %89 = arith.addf %66, %88 : vector<4x4x128xf32>
    %90 = vector.broadcast %6 : f32 to vector<4x4x128xf32>
    %91 = arith.mulf %76, %90 : vector<4x4x128xf32>
    %92 = vector.broadcast %14 : f32 to vector<4x4x128xf32>
    %93 = arith.mulf %78, %92 : vector<4x4x128xf32>
    %94 = arith.addf %91, %93 : vector<4x4x128xf32>
    %95 = vector.broadcast %22 : f32 to vector<4x4x128xf32>
    %96 = arith.mulf %80, %95 : vector<4x4x128xf32>
    %97 = arith.addf %94, %96 : vector<4x4x128xf32>
    %98 = arith.addf %74, %97 : vector<4x4x128xf32>
    %c0_53 = arith.constant 0 : index
    %c1_54 = arith.constant 1 : index
    %c0_55 = arith.constant 0 : index
    %c0_56 = arith.constant 0 : index
    %99 = vector.load %arg5[%c0_53, %c1_54, %c0_55, %c0_56] : memref<3x5x5x128xf32, #tpu.memory_space<vmem>>, vector<1x4x4x128xf32>
    %100 = vector.shape_cast %99 : vector<1x4x4x128xf32> to vector<4x4x128xf32>
    %c1_57 = arith.constant 1 : index
    %c1_58 = arith.constant 1 : index
    %c0_59 = arith.constant 0 : index
    %c0_60 = arith.constant 0 : index
    %101 = vector.load %arg5[%c1_57, %c1_58, %c0_59, %c0_60] : memref<3x5x5x128xf32, #tpu.memory_space<vmem>>, vector<1x4x4x128xf32>
    %102 = vector.shape_cast %101 : vector<1x4x4x128xf32> to vector<4x4x128xf32>
    %c2_61 = arith.constant 2 : index
    %c1_62 = arith.constant 1 : index
    %c0_63 = arith.constant 0 : index
    %c0_64 = arith.constant 0 : index
    %103 = vector.load %arg5[%c2_61, %c1_62, %c0_63, %c0_64] : memref<3x5x5x128xf32, #tpu.memory_space<vmem>>, vector<1x4x4x128xf32>
    %104 = vector.shape_cast %103 : vector<1x4x4x128xf32> to vector<4x4x128xf32>
    %105 = vector.broadcast %1 : f32 to vector<4x4x128xf32>
    %106 = arith.mulf %100, %105 : vector<4x4x128xf32>
    %107 = vector.broadcast %9 : f32 to vector<4x4x128xf32>
    %108 = arith.mulf %102, %107 : vector<4x4x128xf32>
    %109 = arith.addf %106, %108 : vector<4x4x128xf32>
    %110 = vector.broadcast %17 : f32 to vector<4x4x128xf32>
    %111 = arith.mulf %104, %110 : vector<4x4x128xf32>
    %112 = arith.addf %109, %111 : vector<4x4x128xf32>
    %113 = arith.addf %89, %112 : vector<4x4x128xf32>
    %114 = vector.broadcast %5 : f32 to vector<4x4x128xf32>
    %115 = arith.mulf %100, %114 : vector<4x4x128xf32>
    %116 = vector.broadcast %13 : f32 to vector<4x4x128xf32>
    %117 = arith.mulf %102, %116 : vector<4x4x128xf32>
    %118 = arith.addf %115, %117 : vector<4x4x128xf32>
    %119 = vector.broadcast %21 : f32 to vector<4x4x128xf32>
    %120 = arith.mulf %104, %119 : vector<4x4x128xf32>
    %121 = arith.addf %118, %120 : vector<4x4x128xf32>
    %122 = arith.addf %98, %121 : vector<4x4x128xf32>
    %c0_65 = arith.constant 0 : index
    %c1_66 = arith.constant 1 : index
    %c1_67 = arith.constant 1 : index
    %c0_68 = arith.constant 0 : index
    %123 = vector.load %arg5[%c0_65, %c1_66, %c1_67, %c0_68] : memref<3x5x5x128xf32, #tpu.memory_space<vmem>>, vector<1x4x4x128xf32>
    %124 = vector.shape_cast %123 : vector<1x4x4x128xf32> to vector<4x4x128xf32>
    %c1_69 = arith.constant 1 : index
    %c1_70 = arith.constant 1 : index
    %c1_71 = arith.constant 1 : index
    %c0_72 = arith.constant 0 : index
    %125 = vector.load %arg5[%c1_69, %c1_70, %c1_71, %c0_72] : memref<3x5x5x128xf32, #tpu.memory_space<vmem>>, vector<1x4x4x128xf32>
    %126 = vector.shape_cast %125 : vector<1x4x4x128xf32> to vector<4x4x128xf32>
    %c2_73 = arith.constant 2 : index
    %c1_74 = arith.constant 1 : index
    %c1_75 = arith.constant 1 : index
    %c0_76 = arith.constant 0 : index
    %127 = vector.load %arg5[%c2_73, %c1_74, %c1_75, %c0_76] : memref<3x5x5x128xf32, #tpu.memory_space<vmem>>, vector<1x4x4x128xf32>
    %128 = vector.shape_cast %127 : vector<1x4x4x128xf32> to vector<4x4x128xf32>
    %129 = vector.broadcast %0 : f32 to vector<4x4x128xf32>
    %130 = arith.mulf %124, %129 : vector<4x4x128xf32>
    %131 = vector.broadcast %8 : f32 to vector<4x4x128xf32>
    %132 = arith.mulf %126, %131 : vector<4x4x128xf32>
    %133 = arith.addf %130, %132 : vector<4x4x128xf32>
    %134 = vector.broadcast %16 : f32 to vector<4x4x128xf32>
    %135 = arith.mulf %128, %134 : vector<4x4x128xf32>
    %136 = arith.addf %133, %135 : vector<4x4x128xf32>
    %137 = arith.addf %113, %136 : vector<4x4x128xf32>
    %138 = vector.broadcast %4 : f32 to vector<4x4x128xf32>
    %139 = arith.mulf %124, %138 : vector<4x4x128xf32>
    %140 = vector.broadcast %12 : f32 to vector<4x4x128xf32>
    %141 = arith.mulf %126, %140 : vector<4x4x128xf32>
    %142 = arith.addf %139, %141 : vector<4x4x128xf32>
    %143 = vector.broadcast %20 : f32 to vector<4x4x128xf32>
    %144 = arith.mulf %128, %143 : vector<4x4x128xf32>
    %145 = arith.addf %142, %144 : vector<4x4x128xf32>
    %146 = arith.addf %122, %145 : vector<4x4x128xf32>
    %cst = arith.constant 0.000000e+00 : f32
    %147 = vector.broadcast %cst : f32 to vector<2x6x6x128xf32>
    %c0_77 = arith.constant 0 : index
    %c0_78 = arith.constant 0 : index
    %c0_79 = arith.constant 0 : index
    %c0_80 = arith.constant 0 : index
    %148 = vector.load %arg7[%c0_77, %c0_78, %c0_79, %c0_80] : memref<2x6x6x128xf32, #tpu.memory_space<vmem>>, vector<2x6x6x128xf32>
    tpu.vector_store %arg7[%c0_77, %c0_78, %c0_79, %c0_80], %147 {strides = array<i32>} : memref<2x6x6x128xf32, #tpu.memory_space<vmem>>, vector<2x6x6x128xf32>,
    %149 = vector.broadcast %24 : f32 to vector<4x4x128xf32>
    %150 = arith.addf %137, %149 : vector<4x4x128xf32>
    %c0_81 = arith.constant 0 : index
    %c1_82 = arith.constant 1 : index
    %c1_83 = arith.constant 1 : index
    %c0_84 = arith.constant 0 : index
    %151 = vector.load %arg7[%c0_81, %c1_82, %c1_83, %c0_84] : memref<2x6x6x128xf32, #tpu.memory_space<vmem>>, vector<1x4x4x128xf32>
    %152 = vector.shape_cast %151 : vector<1x4x4x128xf32> to vector<4x4x128xf32>
    %153 = vector.shape_cast %150 : vector<4x4x128xf32> to vector<1x4x4x128xf32>
    tpu.vector_store %arg7[%c0_81, %c1_82, %c1_83, %c0_84], %153 {strides = array<i32>} : memref<2x6x6x128xf32, #tpu.memory_space<vmem>>, vector<1x4x4x128xf32>,
    %154 = vector.broadcast %25 : f32 to vector<4x4x128xf32>
    %155 = arith.addf %146, %154 : vector<4x4x128xf32>
    %c1_85 = arith.constant 1 : index
    %c1_86 = arith.constant 1 : index
    %c1_87 = arith.constant 1 : index
    %c0_88 = arith.constant 0 : index
    %156 = vector.load %arg7[%c1_85, %c1_86, %c1_87, %c0_88] : memref<2x6x6x128xf32, #tpu.memory_space<vmem>>, vector<1x4x4x128xf32>
    %157 = vector.shape_cast %156 : vector<1x4x4x128xf32> to vector<4x4x128xf32>
    %158 = vector.shape_cast %155 : vector<4x4x128xf32> to vector<1x4x4x128xf32>
    tpu.vector_store %arg7[%c1_85, %c1_86, %c1_87, %c0_88], %158 {strides = array<i32>} : memref<2x6x6x128xf32, #tpu.memory_space<vmem>>, vector<1x4x4x128xf32>,
    %c0_89 = arith.constant 0 : index
    %c0_90 = arith.constant 0 : index
    %c0_91 = arith.constant 0 : index
    %c0_92 = arith.constant 0 : index
    %159 = vector.load %arg7[%c0_89, %c0_90, %c0_91, %c0_92] : memref<2x6x6x128xf32, #tpu.memory_space<vmem>>, vector<1x5x5x128xf32>
    %160 = vector.shape_cast %159 : vector<1x5x5x128xf32> to vector<5x5x128xf32>
    %c1_93 = arith.constant 1 : index
    %c0_94 = arith.constant 0 : index
    %c0_95 = arith.constant 0 : index
    %c0_96 = arith.constant 0 : index
    %161 = vector.load %arg7[%c1_93, %c0_94, %c0_95, %c0_96] : memref<2x6x6x128xf32, #tpu.memory_space<vmem>>, vector<1x5x5x128xf32>
    %162 = vector.shape_cast %161 : vector<1x5x5x128xf32> to vector<5x5x128xf32>
    %163 = vector.broadcast %29 : f32 to vector<5x5x128xf32>
    %164 = arith.mulf %160, %163 : vector<5x5x128xf32>
    %165 = vector.broadcast %41 : f32 to vector<5x5x128xf32>
    %166 = arith.mulf %162, %165 : vector<5x5x128xf32>
    %167 = arith.addf %164, %166 : vector<5x5x128xf32>
    %168 = vector.broadcast %33 : f32 to vector<5x5x128xf32>
    %169 = arith.mulf %160, %168 : vector<5x5x128xf32>
    %170 = vector.broadcast %45 : f32 to vector<5x5x128xf32>
    %171 = arith.mulf %162, %170 : vector<5x5x128xf32>
    %172 = arith.addf %169, %171 : vector<5x5x128xf32>
    %173 = vector.broadcast %37 : f32 to vector<5x5x128xf32>
    %174 = arith.mulf %160, %173 : vector<5x5x128xf32>
    %175 = vector.broadcast %49 : f32 to vector<5x5x128xf32>
    %176 = arith.mulf %162, %175 : vector<5x5x128xf32>
    %177 = arith.addf %174, %176 : vector<5x5x128xf32>
    %c0_97 = arith.constant 0 : index
    %c0_98 = arith.constant 0 : index
    %c1_99 = arith.constant 1 : index
    %c0_100 = arith.constant 0 : index
    %178 = vector.load %arg7[%c0_97, %c0_98, %c1_99, %c0_100] : memref<2x6x6x128xf32, #tpu.memory_space<vmem>>, vector<1x5x5x128xf32>
    %179 = vector.shape_cast %178 : vector<1x5x5x128xf32> to vector<5x5x128xf32>
    %c1_101 = arith.constant 1 : index
    %c0_102 = arith.constant 0 : index
    %c1_103 = arith.constant 1 : index
    %c0_104 = arith.constant 0 : index
    %180 = vector.load %arg7[%c1_101, %c0_102, %c1_103, %c0_104] : memref<2x6x6x128xf32, #tpu.memory_space<vmem>>, vector<1x5x5x128xf32>
    %181 = vector.shape_cast %180 : vector<1x5x5x128xf32> to vector<5x5x128xf32>
    %182 = vector.broadcast %28 : f32 to vector<5x5x128xf32>
    %183 = arith.mulf %179, %182 : vector<5x5x128xf32>
    %184 = vector.broadcast %40 : f32 to vector<5x5x128xf32>
    %185 = arith.mulf %181, %184 : vector<5x5x128xf32>
    %186 = arith.addf %183, %185 : vector<5x5x128xf32>
    %187 = arith.addf %167, %186 : vector<5x5x128xf32>
    %188 = vector.broadcast %32 : f32 to vector<5x5x128xf32>
    %189 = arith.mulf %179, %188 : vector<5x5x128xf32>
    %190 = vector.broadcast %44 : f32 to vector<5x5x128xf32>
    %191 = arith.mulf %181, %190 : vector<5x5x128xf32>
    %192 = arith.addf %189, %191 : vector<5x5x128xf32>
    %193 = arith.addf %172, %192 : vector<5x5x128xf32>
    %194 = vector.broadcast %36 : f32 to vector<5x5x128xf32>
    %195 = arith.mulf %179, %194 : vector<5x5x128xf32>
    %196 = vector.broadcast %48 : f32 to vector<5x5x128xf32>
    %197 = arith.mulf %181, %196 : vector<5x5x128xf32>
    %198 = arith.addf %195, %197 : vector<5x5x128xf32>
    %199 = arith.addf %177, %198 : vector<5x5x128xf32>
    %c0_105 = arith.constant 0 : index
    %c1_106 = arith.constant 1 : index
    %c0_107 = arith.constant 0 : index
    %c0_108 = arith.constant 0 : index
    %200 = vector.load %arg7[%c0_105, %c1_106, %c0_107, %c0_108] : memref<2x6x6x128xf32, #tpu.memory_space<vmem>>, vector<1x5x5x128xf32>
    %201 = vector.shape_cast %200 : vector<1x5x5x128xf32> to vector<5x5x128xf32>
    %c1_109 = arith.constant 1 : index
    %c1_110 = arith.constant 1 : index
    %c0_111 = arith.constant 0 : index
    %c0_112 = arith.constant 0 : index
    %202 = vector.load %arg7[%c1_109, %c1_110, %c0_111, %c0_112] : memref<2x6x6x128xf32, #tpu.memory_space<vmem>>, vector<1x5x5x128xf32>
    %203 = vector.shape_cast %202 : vector<1x5x5x128xf32> to vector<5x5x128xf32>
    %204 = vector.broadcast %27 : f32 to vector<5x5x128xf32>
    %205 = arith.mulf %201, %204 : vector<5x5x128xf32>
    %206 = vector.broadcast %39 : f32 to vector<5x5x128xf32>
    %207 = arith.mulf %203, %206 : vector<5x5x128xf32>
    %208 = arith.addf %205, %207 : vector<5x5x128xf32>
    %209 = arith.addf %187, %208 : vector<5x5x128xf32>
    %210 = vector.broadcast %31 : f32 to vector<5x5x128xf32>
    %211 = arith.mulf %201, %210 : vector<5x5x128xf32>
    %212 = vector.broadcast %43 : f32 to vector<5x5x128xf32>
    %213 = arith.mulf %203, %212 : vector<5x5x128xf32>
    %214 = arith.addf %211, %213 : vector<5x5x128xf32>
    %215 = arith.addf %193, %214 : vector<5x5x128xf32>
    %216 = vector.broadcast %35 : f32 to vector<5x5x128xf32>
    %217 = arith.mulf %201, %216 : vector<5x5x128xf32>
    %218 = vector.broadcast %47 : f32 to vector<5x5x128xf32>
    %219 = arith.mulf %203, %218 : vector<5x5x128xf32>
    %220 = arith.addf %217, %219 : vector<5x5x128xf32>
    %221 = arith.addf %199, %220 : vector<5x5x128xf32>
    %c0_113 = arith.constant 0 : index
    %c1_114 = arith.constant 1 : index
    %c1_115 = arith.constant 1 : index
    %c0_116 = arith.constant 0 : index
    %222 = vector.load %arg7[%c0_113, %c1_114, %c1_115, %c0_116] : memref<2x6x6x128xf32, #tpu.memory_space<vmem>>, vector<1x5x5x128xf32>
    %223 = vector.shape_cast %222 : vector<1x5x5x128xf32> to vector<5x5x128xf32>
    %c1_117 = arith.constant 1 : index
    %c1_118 = arith.constant 1 : index
    %c1_119 = arith.constant 1 : index
    %c0_120 = arith.constant 0 : index
    %224 = vector.load %arg7[%c1_117, %c1_118, %c1_119, %c0_120] : memref<2x6x6x128xf32, #tpu.memory_space<vmem>>, vector<1x5x5x128xf32>
    %225 = vector.shape_cast %224 : vector<1x5x5x128xf32> to vector<5x5x128xf32>
    %226 = vector.broadcast %26 : f32 to vector<5x5x128xf32>
    %227 = arith.mulf %223, %226 : vector<5x5x128xf32>
    %228 = vector.broadcast %38 : f32 to vector<5x5x128xf32>
    %229 = arith.mulf %225, %228 : vector<5x5x128xf32>
    %230 = arith.addf %227, %229 : vector<5x5x128xf32>
    %231 = arith.addf %209, %230 : vector<5x5x128xf32>
    %232 = vector.broadcast %30 : f32 to vector<5x5x128xf32>
    %233 = arith.mulf %223, %232 : vector<5x5x128xf32>
    %234 = vector.broadcast %42 : f32 to vector<5x5x128xf32>
    %235 = arith.mulf %225, %234 : vector<5x5x128xf32>
    %236 = arith.addf %233, %235 : vector<5x5x128xf32>
    %237 = arith.addf %215, %236 : vector<5x5x128xf32>
    %238 = vector.broadcast %34 : f32 to vector<5x5x128xf32>
    %239 = arith.mulf %223, %238 : vector<5x5x128xf32>
    %240 = vector.broadcast %46 : f32 to vector<5x5x128xf32>
    %241 = arith.mulf %225, %240 : vector<5x5x128xf32>
    %242 = arith.addf %239, %241 : vector<5x5x128xf32>
    %243 = arith.addf %221, %242 : vector<5x5x128xf32>
    %244 = vector.broadcast %50 : f32 to vector<5x5x128xf32>
    %245 = arith.addf %231, %244 : vector<5x5x128xf32>
    %c0_121 = arith.constant 0 : index
    %c0_122 = arith.constant 0 : index
    %c0_123 = arith.constant 0 : index
    %c0_124 = arith.constant 0 : index
    %246 = vector.load %arg6[%c0_121, %c0_122, %c0_123, %c0_124] : memref<3x5x5x128xf32, #tpu.memory_space<vmem>>, vector<1x5x5x128xf32>
    %247 = vector.shape_cast %246 : vector<1x5x5x128xf32> to vector<5x5x128xf32>
    %248 = vector.shape_cast %245 : vector<5x5x128xf32> to vector<1x5x5x128xf32>
    tpu.vector_store %arg6[%c0_121, %c0_122, %c0_123, %c0_124], %248 {strides = array<i32>} : memref<3x5x5x128xf32, #tpu.memory_space<vmem>>, vector<1x5x5x128xf32>,
    %249 = vector.broadcast %51 : f32 to vector<5x5x128xf32>
    %250 = arith.addf %237, %249 : vector<5x5x128xf32>
    %c1_125 = arith.constant 1 : index
    %c0_126 = arith.constant 0 : index
    %c0_127 = arith.constant 0 : index
    %c0_128 = arith.constant 0 : index
    %251 = vector.load %arg6[%c1_125, %c0_126, %c0_127, %c0_128] : memref<3x5x5x128xf32, #tpu.memory_space<vmem>>, vector<1x5x5x128xf32>
    %252 = vector.shape_cast %251 : vector<1x5x5x128xf32> to vector<5x5x128xf32>
    %253 = vector.shape_cast %250 : vector<5x5x128xf32> to vector<1x5x5x128xf32>
    tpu.vector_store %arg6[%c1_125, %c0_126, %c0_127, %c0_128], %253 {strides = array<i32>} : memref<3x5x5x128xf32, #tpu.memory_space<vmem>>, vector<1x5x5x128xf32>,
    %254 = vector.broadcast %52 : f32 to vector<5x5x128xf32>
    %255 = arith.addf %243, %254 : vector<5x5x128xf32>
    %c2_129 = arith.constant 2 : index
    %c0_130 = arith.constant 0 : index
    %c0_131 = arith.constant 0 : index
    %c0_132 = arith.constant 0 : index
    %256 = vector.load %arg6[%c2_129, %c0_130, %c0_131, %c0_132] : memref<3x5x5x128xf32, #tpu.memory_space<vmem>>, vector<1x5x5x128xf32>
    %257 = vector.shape_cast %256 : vector<1x5x5x128xf32> to vector<5x5x128xf32>
    %258 = vector.shape_cast %255 : vector<5x5x128xf32> to vector<1x5x5x128xf32>
    tpu.vector_store %arg6[%c2_129, %c0_130, %c0_131, %c0_132], %258 {strides = array<i32>} : memref<3x5x5x128xf32, #tpu.memory_space<vmem>>, vector<1x5x5x128xf32>,
    return
  }
  func.func @transform_0(%arg0: i32) -> i32 {
    %c0_i32 = arith.constant 0 : i32
    %c0_i32_0 = arith.constant 0 : i32
    return %c0_i32 : i32
  }
  func.func @transform_1(%arg0: i32) -> i32 {
    %c0_i32 = arith.constant 0 : i32
    %c0_i32_0 = arith.constant 0 : i32
    return %c0_i32 : i32
  }
  func.func @transform_2(%arg0: i32) -> i32 {
    %c0_i32 = arith.constant 0 : i32
    %c0_i32_0 = arith.constant 0 : i32
    return %c0_i32 : i32
  }
  func.func @transform_3(%arg0: i32) -> i32 {
    %c0_i32 = arith.constant 0 : i32
    %c0_i32_0 = arith.constant 0 : i32
    return %c0_i32 : i32
  }
  func.func @transform_4(%arg0: i32) -> (i32, i32, i32, i32) {
    %c0_i32 = arith.constant 0 : i32
    %c0_i32_0 = arith.constant 0 : i32
    %c0_i32_1 = arith.constant 0 : i32
    %c0_i32_2 = arith.constant 0 : i32
    return %c0_i32, %c0_i32_0, %c0_i32_1, %arg0 : i32, i32, i32, i32
  }
  func.func @transform_5(%arg0: i32) -> (i32, i32, i32, i32) {
    %c0_i32 = arith.constant 0 : i32
    %c0_i32_0 = arith.constant 0 : i32
    %c0_i32_1 = arith.constant 0 : i32
    %c0_i32_2 = arith.constant 0 : i32
    return %c0_i32, %c0_i32_0, %c0_i32_1, %arg0 : i32, i32, i32, i32
  }
}

</mosaic_0001>

<bundles_post_ra>
// kernel: forward.1
= control target key start
LH: loop header
LB: loop body
LE: loop exit
PB: predicated region body
PF: predicated region fallthrough
CT: control target
= control target key end

     0   :  { %10 = vsyncpa [#allocation4], 0  ;;  %s2012_s0 = inlined_call_operand.vmem [shape: f32[24], index: 0, kind: input, shape index: {}]   ;;  %s2013_s1 = inlined_call_operand.vmem [shape: f32[2], index: 1, kind: input, shape index: {}]   ;;  %s2014_s2 = inlined_call_operand.vmem [shape: f32[24], index: 2, kind: input, shape index: {}]   ;;  %s2015_s3 = inlined_call_operand.vmem [shape: f32[3], index: 3, kind: input, shape index: {}]   ;;  %s2016_s4 = inlined_call_operand.vmem [shape: f32[3,5,5,128], index: 4, kind: input, shape index: {}]   ;;  %s2017_s5 = inlined_call_operand.vmem [shape: f32[3,5,5,128], index: 5, kind: output, shape index: {}]  }
   0x1   :  { %11 = vsyncpa [#allocation6], 0  ;;  %s29_s20 = sshll.u32 %s2013_s1, 4  ;;  %s30_s20 = int_to_ptr.vmem [resolvable:$true] %s29_s20 }
   0x2   :  { %12 = vsyncpa [#allocation9], 0  ;;  %s19_s23 = sshll.u32 %s2012_s0, 4  ;;  %s850_s24 = scalar_lea.vmem %s30_s20, 16  ;;  %s20_s23 = int_to_ptr.vmem [resolvable:$true] %s19_s23 }
   0x3   :  { %p851_p0 = scmp.ne.s32.totalorder %s30_s20, %s850_s24  ;;  %p855_p1 = scmp.lt.s32.totalorder %s30_s20, %s30_s20 }
   0x4   :  { %p856_p2 = scmp.lt.s32.totalorder %s850_s24, %s850_s24 }
   0x6   :  { %p857_p3 = por %p856_p2, %p855_p1 }
   0x8   :  { %p858_p4 = pnand %p857_p3, %p851_p0 }
   0xa   :  { %861 = shalt.err (!%p858_p4)
}
   0xb   :  { %s904_s25 = smov [#allocation5]   ;;  %s862_s26 = scalar_lea.vmem %s20_s23, 16 }
   0xc   :  { %32 = dma.vmem_to_smem %s30_s20, 16, %s904_s25, [#allocation6]  }
   0xd   :  { %p863_p5 = scmp.ne.s32.totalorder %s20_s23, %s862_s26  ;;  %p867_p6 = scmp.lt.s32.totalorder %s20_s23, %s20_s23 }
   0xe   :  { %p868_p7 = scmp.lt.s32.totalorder %s862_s26, %s862_s26 }
  0x10   :  { %p869_p8 = por %p868_p7, %p867_p6 }
  0x12   :  { %p870_p9 = pnand %p869_p8, %p863_p5 }
  0x14   :  { %873 = shalt.err (!%p870_p9)
}
  0x15   :  { %s905_s1 = smov [#allocation3]   ;;  %s39_s28 = sshll.u32 %s2014_s2, 4  ;;  %s40_s28 = int_to_ptr.vmem [resolvable:$true] %s39_s28 }
  0x16   :  { %22 = dma.vmem_to_smem %s20_s23, 16, %s905_s1, [#allocation4]  }
  0x17   :  { %s49_s6 = sshll.u32 %s2015_s3, 4  ;;  %s874_s7 = scalar_lea.vmem %s40_s28, 16  ;;  %s50_s6 = int_to_ptr.vmem [resolvable:$true] %s49_s6 }
  0x18   :  { %p875_p10 = scmp.ne.s32.totalorder %s40_s28, %s874_s7  ;;  %p879_p11 = scmp.lt.s32.totalorder %s40_s28, %s40_s28 }
  0x19   :  { %p880_p12 = scmp.lt.s32.totalorder %s874_s7, %s874_s7 }
  0x1b   :  { %p881_p13 = por %p880_p12, %p879_p11 }
  0x1d   :  { %p882_p0 = pnand %p881_p13, %p875_p10 }
  0x1f   :  { %885 = shalt.err (!%p882_p0)
}
  0x20   :  { %s906_s8 = smov [#allocation7]   ;;  %s886_s9 = scalar_lea.vmem %s50_s6, 16 }
  0x21   :  { %42 = dma.vmem_to_smem %s40_s28, 16, %s906_s8, [#allocation6]  }
  0x22   :  { %p887_p1 = scmp.ne.s32.totalorder %s50_s6, %s886_s9  ;;  %p891_p2 = scmp.lt.s32.totalorder %s50_s6, %s50_s6 }
  0x23   :  { %p892_p3 = scmp.lt.s32.totalorder %s886_s9, %s886_s9 }
  0x25   :  { %p893_p4 = por %p892_p3, %p891_p2 }
  0x27   :  { %p894_p5 = pnand %p893_p4, %p887_p1 }
  0x29   :  { %897 = shalt.err (!%p894_p5)
}
  0x2a   :  { %s907_s2 = smov [#allocation8]  }
  0x2b   :  { %52 = dma.vmem_to_smem %s50_s6, 16, %s907_s2, [#allocation9]  }
  0x2c   :  { %898 = dma.done.wait [#allocation4], 16  }
  0x2d   :  { %899 = vsyncadd [#allocation4], 4294967280 }
  0x2e   :  { %900 = dma.done.wait [#allocation6], 32  }
  0x2f   :  { %901 = vsyncadd [#allocation6], 4294967264 }
  0x30   :  { %902 = dma.done.wait [#allocation9], 16  }
  0x31   :  { %903 = vsyncadd [#allocation9], 4294967280 }
  0x32   :  { %67 = sfence }
  0x33   :  { %s951_s3 = sld [smem:[#allocation3]]  ;;  %s746_s10 = sld [smem:[#allocation3 + $0x1]]  ;;  %v908_v0 = vmov 0.0   ;;  %v960_v1 = vld [vmem:[%s2016_s4] sm:$0xf] }
  0x34   :  { %382 = vst [vmem:[#allocation2] sm:$0x3f] %v908_v0  ;;  %383 = vst [vmem:[#allocation2 + $0x8] sm:$0x3f] %v908_v0  ;;  %s747_s11 = sld [smem:[#allocation3 + $0x2]]  ;;  %s748_s12 = sld [smem:[#allocation3 + $0x3]] }
  0x35   :  { %384 = vst [vmem:[#allocation2 + $0x10] sm:$0x3f] %v908_v0  ;;  %385 = vst [vmem:[#allocation2 + $0x18] sm:$0x3f] %v908_v0  ;;  %s953_s13 = sld [smem:[#allocation3 + $0x8]]  ;;  %s754_s14 = sld [smem:[#allocation3 + $0x9]] }
  0x36   :  { %386 = vst [vmem:[#allocation2 + $0x20] sm:$0x3f] %v908_v0  ;;  %387 = vst [vmem:[#allocation2 + $0x28] sm:$0x3f] %v908_v0  ;;  %s755_s15 = sld [smem:[#allocation3 + $0xa]]  ;;  %s756_s16 = sld [smem:[#allocation3 + $0xb]] }
  0x37   :  { %388 = vst [vmem:[#allocation2 + $0x30] sm:$0x3f] %v908_v0  ;;  %389 = vst [vmem:[#allocation2 + $0x38] sm:$0x3f] %v908_v0  ;;  %s955_s17 = sld [smem:[#allocation3 + $0x10]]  ;;  %s762_s18 = sld [smem:[#allocation3 + $0x11]] }
  0x38   :  { %390 = vst [vmem:[#allocation2 + $0x40] sm:$0x3f] %v908_v0  ;;  %391 = vst [vmem:[#allocation2 + $0x48] sm:$0x3f] %v908_v0  ;;  %s962_s21 = sld [smem:[#allocation3 + $0x12]]  ;;  %s764_s22 = sld [smem:[#allocation3 + $0x13]] }
  0x39   :  { %392 = vst [vmem:[#allocation2 + $0x50] sm:$0x3f] %v908_v0  ;;  %393 = vst [vmem:[#allocation2 + $0x58] sm:$0x3f] %v908_v0  ;;  %v967_v2 = vld [vmem:[%s2016_s4 + $0x1] sm:$0xf]  ;;  %v981_v5 = vstv %s746_s10  ;;  %v984_v6 = vstv %s951_s3 }
  0x3a   :  { %s969_s25 = sld [smem:[#allocation5]]  ;;  %v974_v3 = vld [vmem:[%s2016_s4 + $0x28] sm:$0xf]  ;;  %v986_v7 = vstv %s748_s12  ;;  %v993_v9 = vstv %s747_s11  ;;  %v998_v10 = vld [vmem:[%s2016_s4 + $0x30] sm:$0xf]  ;;  %s1233_s2 = sld [smem:[#allocation3 + $0x6]] }
  0x3b   :  { %v979_v4 = vld [vmem:[%s2016_s4 + $0x8] sm:$0xf]  ;;  %v136_v12 = vmul.f32 %v986_v7, %v960_v1  ;;  %v194_v13 = vmul.f32 %v993_v9, %v967_v2  ;;  %v1009_v14 = vld [vmem:[%s2016_s4 + $0x58] sm:$0xf]  ;;  %v1011_v15 = vstv %s754_s14  ;;  %v1021_v17 = vld [vmem:[%s2016_s4 + $0x50] sm:$0xf] }
  0x3c   :  { %v991_v8 = vld [vmem:[%s2016_s4 + $0x29] sm:$0xf]  ;;  %v263_v11 = vmul.f32 %v979_v4, %v981_v5  ;;  %v1023_v18 = vstv %s756_s16  ;;  %v1028_v19 = vld [vmem:[%s2016_s4 + $0x51] sm:$0xf]  ;;  %v1030_v20 = vstv %s755_s15  ;;  %v268_v21 = vmul.f32 %v998_v10, %v1011_v15  ;;  %s1267_s20 = sld [smem:[#allocation3 + $0xf]]  ;;  %s1313_s6 = sld [smem:[#allocation3 + $0xe]] }
  0x3d   :  { %v1016_v16 = vld [vmem:[%s2016_s4 + $0x9] sm:$0xf]  ;;  %v141_v23 = vmul.f32 %v974_v3, %v1023_v18  ;;  %v199_v24 = vmul.f32 %v991_v8, %v1030_v20  ;;  %v1040_v25 = vstv %s762_s18  ;;  %v1045_v26 = vld [vmem:[%s2016_s4 + $0x31] sm:$0xf]  ;;  %v1050_v27 = vld [vmem:[%s2016_s4 + $0x59] sm:$0xf] }
  0x3e   :  { %v329_v22 = vmul.f32 %v1016_v16, %v984_v6  ;;  %v1053_v28 = vstv %s953_s13  ;;  %v1055_v29 = vstv %s764_s22  ;;  %v1058_v30 = vstv %s962_s21  ;;  %v1065_v33 = vld [vmem:[%s2016_s4 + $0x8] sm:$0xf]  ;;  %s1265_s18 = sld [smem:[#allocation3 + $0x7]]  ;;  %s1315_s7 = sld [smem:[#allocation3 + $0x16]] }
  0x3f   :  { %v272_v31 = vadd.f32 %v268_v21, %v263_v11  ;;  %v277_v32 = vmul.f32 %v1009_v14, %v1040_v25  ;;  %v1070_v34 = vld [vmem:[%s2016_s4 + $0x30] sm:$0xf]  ;;  %v145_v35 = vadd.f32 %v141_v23, %v136_v12  ;;  %v150_v36 = vmul.f32 %v1021_v17, %v1055_v29  ;;  %v1079_v39 = vld [vmem:[%s2016_s4 + $0x58] sm:$0xf]  ;;  %v1084_v40 = vld [vmem:[%s2016_s4 + $0x9] sm:$0xf] }
  0x40   :  { %v203_v37 = vadd.f32 %v199_v24, %v194_v13  ;;  %v208_v38 = vmul.f32 %v1028_v19, %v1058_v30  ;;  %v1089_v41 = vld [vmem:[%s2016_s4 + $0x31] sm:$0xf]  ;;  %v334_v43 = vmul.f32 %v1045_v26, %v1053_v28  ;;  %v1094_v44 = vstv %s955_s17  ;;  %v1102_v46 = vld [vmem:[%s2016_s4 + $0x59] sm:$0xf]  ;;  %v1121_v53 = vld [vmem:[%s2016_s4 + $0x60] sm:$0xf] }
  0x41   :  { %v281_v42 = vadd.f32 %v277_v32, %v272_v31  ;;  %v1097_v45 = vstv %s969_s25  ;;  %v1107_v47 = vld [vmem:[%s2016_s4 + $0x10] sm:$0xf]  ;;  %v154_v48 = vadd.f32 %v150_v36, %v145_v35  ;;  %v343_v50 = vmul.f32 %v1050_v27, %v1094_v44  ;;  %v1116_v52 = vld [vmem:[%s2016_s4 + $0x38] sm:$0xf]  ;;  %v1148_v0 = vld [vmem:[%s2016_s4 + $0x61] sm:$0xf] }
  0x42   :  { %v212_v49 = vadd.f32 %v208_v38, %v203_v37  ;;  %v137_v51 = vmul.f32 %v986_v7, %v1065_v33  ;;  %v338_v54 = vadd.f32 %v334_v43, %v329_v22  ;;  %v142_v55 = vmul.f32 %v1070_v34, %v1023_v18  ;;  %v1132_v58 = vld [vmem:[%s2016_s4 + $0x11] sm:$0xf]  ;;  %v1137_v59 = vld [vmem:[%s2016_s4 + $0x39] sm:$0xf]  ;;  %v1171_v36 = vld [vmem:[%s2016_s4 + $0x60] sm:$0xf] }
  0x43   :  { %v151_v56 = vmul.f32 %v1079_v39, %v1055_v29  ;;  %v195_v57 = vmul.f32 %v993_v9, %v1084_v40  ;;  %v200_v61 = vmul.f32 %v1089_v41, %v1030_v20  ;;  %v209_v62 = vmul.f32 %v1102_v46, %v1058_v30  ;;  %v1153_v11 = vld [vmem:[%s2016_s4 + $0x10] sm:$0xf]  ;;  %v1162_v23 = vld [vmem:[%s2016_s4 + $0x38] sm:$0xf]  ;;  %s1220_s25 = sld [smem:[#allocation3 + $0x4]]  ;;  %s1283_s22 = sld [smem:[#allocation3 + $0x17]] }
  0x44   :  { %v216_v60 = vadd.f32 %v212_v49, %v154_v48  ;;  %v264_v63 = vmul.f32 %v1107_v47, %v981_v5  ;;  %v347_v12 = vadd.f32 %v343_v50, %v338_v54  ;;  %v146_v13 = vadd.f32 %v142_v55, %v137_v51  ;;  %v1176_v37 = vld [vmem:[%s2016_s4 + $0x11] sm:$0xf]  ;;  %v1181_v38 = vld [vmem:[%s2016_s4 + $0x39] sm:$0xf]  ;;  %s1332_s11 = sld [smem:[#allocation3 + $0x5]]  ;;  %s1352_s16 = sld [smem:[#allocation3 + $0x14]] }
  0x45   :  { %v269_v21 = vmul.f32 %v1116_v52, %v1011_v15  ;;  %v278_v22 = vmul.f32 %v1121_v53, %v1040_v25  ;;  %v204_v31 = vadd.f32 %v200_v61, %v195_v57  ;;  %v330_v32 = vmul.f32 %v1132_v58, %v984_v6  ;;  %2051 = vst [vmem:[#allocation13_spill] sm:$0xff] %v1176_v37  ;;  %v1192_v57 = vld [vmem:[%s2016_s4 + $0x61] sm:$0xf]  ;;  %s1338_s12 = sld [smem:[#allocation3 + $0xd]]  ;;  %s1364_s15 = sld [smem:[#allocation5 + $0x1]] }
  0x46   :  { %v285_v24 = vadd.f32 %v281_v42, %v216_v60  ;;  %v335_v35 = vmul.f32 %v1137_v59, %v1053_v28  ;;  %2052 = vst [vmem:[#allocation14_spill] sm:$0xff] %v1181_v38  ;;  %v155_v42 = vadd.f32 %v151_v56, %v146_v13  ;;  %v344_v48 = vmul.f32 %v1148_v0, %v1094_v44  ;;  %v1197_v56 = vld [vmem:[%s2016_s4 + $0x18] sm:$0xf]  ;;  %v1202_v60 = vld [vmem:[%s2016_s4 + $0x40] sm:$0xf]  ;;  %s1340_s14 = sld [smem:[#allocation3 + $0x15]] }
  0x47   :  { %v273_v43 = vadd.f32 %v269_v21, %v264_v63  ;;  %v138_v49 = vmul.f32 %v986_v7, %v1153_v11  ;;  %v213_v51 = vadd.f32 %v209_v62, %v204_v31  ;;  %v143_v55 = vmul.f32 %v1162_v23, %v1023_v18  ;;  %2053 = vst [vmem:[#allocation15_spill] sm:$0xff] %v1192_v57  ;;  %v1213_v13 = vld [vmem:[%s2016_s4 + $0x68] sm:$0xf]  ;;  %v1218_v21 = vld [vmem:[%s2016_s4 + $0x19] sm:$0xf]  ;;  %s1478_s19 = sld [smem:[#allocation7 + $0x2]] }
  0x48   :  { %v351_v50 = vadd.f32 %v347_v12, %v285_v24  ;;  %v339_v54 = vadd.f32 %v335_v35, %v330_v32  ;;  %2054 = vst [vmem:[#allocation16_spill] sm:$0xff] %v1197_v56  ;;  %2055 = vst [vmem:[#allocation17_spill] sm:$0xff] %v1202_v60  ;;  %v152_v62 = vmul.f32 %v1171_v36, %v1055_v29  ;;  %v1226_v35 = vld [vmem:[%s2016_s4 + $0x41] sm:$0xf]  ;;  %s1491_s23 = sld [smem:[#allocation7 + $0x1]]  ;;  %s1493_s24 = sld [smem:[#allocation7 + $0xd]] }
  0x49   :  { %v282_v61 = vadd.f32 %v278_v22, %v273_v43  ;;  %v196_v63 = vmul.f32 %v993_v9, %v1176_v37  ;;  %v201_v12 = vmul.f32 %v1181_v38, %v1030_v20  ;;  %v217_v24 = vadd.f32 %v213_v51, %v155_v42  ;;  %v1231_v43 = vld [vmem:[%s2016_s4 + $0x69] sm:$0xf]  ;;  %s1501_s13 = sld [smem:[#allocation7 + $0xc]]  ;;  %s1507_s21 = sld [smem:[#allocation8]] }
  0x4a   :  { %v395_v22 = vadd.f32 %v1097_v45, %v351_v50  ;;  %v348_v31 = vadd.f32 %v344_v48, %v339_v54  ;;  %v147_v32 = vadd.f32 %v143_v55, %v138_v49  ;;  %2056 = vst [vmem:[#allocation18_spill] sm:$0xff] %v1231_v43  ;;  %v210_v37 = vmul.f32 %v1192_v57, %v1058_v30  ;;  %v1244_v49 = vld [vmem:[%s2016_s4 + $0x18] sm:$0xf]  ;;  %v1249_v50 = vld [vmem:[%s2016_s4 + $0x40] sm:$0xf]  ;;  %s1521_s26 = sld [smem:[#allocation7 + $0x6]] }
  0x4b   :  { %v205_v38 = vadd.f32 %v201_v12, %v196_v63  ;;  %v265_v42 = vmul.f32 %v1197_v56, %v981_v5  ;;  %v270_v48 = vmul.f32 %v1202_v60, %v1011_v15  ;;  %2057 = vst [vmem:[#allocation19_spill] sm:$0xff] %v1244_v49  ;;  %2058 = vst [vmem:[#allocation20_spill] sm:$0xff] %v1249_v50  ;;  %v1254_v51 = vld [vmem:[%s2016_s4 + $0x68] sm:$0xf]  ;;  %v1263_v60 = vld [vmem:[%s2016_s4 + $0x19] sm:$0xf] }
  0x4c   :  { %2059 = vst [vmem:[#allocation21_spill] sm:$0xff] %v1254_v51  ;;  %400 = vst [vmem:[#allocation2 + $0x9] sm:$0xf] %v395_v22  ;;  %v286_v54 = vadd.f32 %v282_v61, %v217_v24  ;;  %v156_v55 = vadd.f32 %v152_v62, %v147_v32  ;;  %v279_v63 = vmul.f32 %v1213_v13, %v1040_v25  ;;  %v1276_v22 = vld [vmem:[%s2016_s4 + $0x41] sm:$0xf]  ;;  %s1531_s1 = sld [smem:[#allocation7 + $0x12]] }
  0x4d   :  { %v331_v12 = vmul.f32 %v1218_v21, %v984_v6  ;;  %v214_v56 = vadd.f32 %v210_v37, %v205_v38  ;;  %v274_v57 = vadd.f32 %v270_v48, %v265_v42  ;;  %v336_v61 = vmul.f32 %v1226_v35, %v1053_v28  ;;  %v1281_v24 = vld [vmem:[%s2016_s4 + $0x69] sm:$0xf]  ;;  %v1294_v48 = vld [vmem:[%s2016_s4 + $0x20] sm:$0xf]  ;;  %s1533_s0 = sld [smem:[#allocation7 + $0x13]]  ;;  %s1543_s27 = sld [smem:[#allocation7 + $0x4]] }
  0x4e   :  { %v345_v62 = vmul.f32 %v1231_v43, %v1094_v44  ;;  %v352_v37 = vadd.f32 %v348_v31, %v286_v54  ;;  %v139_v38 = vmul.f32 %v986_v7, %v1244_v49  ;;  %v144_v32 = vmul.f32 %v1249_v50, %v1023_v18  ;;  %v1299_v43 = vld [vmem:[%s2016_s4 + $0x48] sm:$0xf]  ;;  %v1304_v7 = vld [vmem:[%s2016_s4 + $0x70] sm:$0xf]  ;;  %s1554_s28 = sld [smem:[#allocation7 + $0x5]]  ;;  %s1556_s29 = sld [smem:[#allocation7 + $0x11]] }
  0x4f   :  { %v153_v42 = vmul.f32 %v1254_v51, %v1055_v29  ;;  %v218_v31 = vadd.f32 %v214_v56, %v156_v55  ;;  %v283_v18 = vadd.f32 %v279_v63, %v274_v57  ;;  %v340_v54 = vadd.f32 %v336_v61, %v331_v12  ;;  %v1311_v51 = vld [vmem:[%s2016_s4 + $0x21] sm:$0xf]  ;;  %v1330_v55 = vld [vmem:[%s2016_s4 + $0x71] sm:$0xf]  ;;  %s1573_s30 = sld [smem:[#allocation7 + $0x10]]  ;;  %s1575_s17 = sld [smem:[#allocation8 + $0x1]] }
  0x50   :  { %v197_v29 = vmul.f32 %v993_v9, %v1263_v60  ;;  %v396_v50 = vadd.f32 %v1097_v45, %v352_v37  ;;  %v148_v49 = vadd.f32 %v144_v32, %v139_v38  ;;  %v202_v56 = vmul.f32 %v1276_v22, %v1030_v20  ;;  %v1325_v9 = vld [vmem:[%s2016_s4 + $0x49] sm:$0xf]  ;;  %s1350_s4 = sld [smem:[#allocation3 + $0xc]]  ;;  %s1596_s8 = sld [smem:[#allocation7 + $0x17]] }
  0x51   :  { %v211_v57 = vmul.f32 %v1281_v24, %v1058_v30  ;;  %v287_v63 = vadd.f32 %v283_v18, %v218_v31  ;;  %v349_v12 = vadd.f32 %v345_v62, %v340_v54  ;;  %v266_v20 = vmul.f32 %v1294_v48, %v981_v5  ;;  %s1602_s9 = sld [smem:[#allocation7 + $0x16]]  ;;  %s1614_s3 = sld [smem:[#allocation7 + $0x9]] }
  0x52   :  { %v271_v30 = vmul.f32 %v1299_v43, %v1011_v15  ;;  %401 = vst [vmem:[#allocation2 + $0x11] sm:$0xf] %v396_v50  ;;  %v157_v61 = vadd.f32 %v153_v42, %v148_v49  ;;  %v206_v37 = vadd.f32 %v202_v56, %v197_v29  ;;  %v280_v38 = vmul.f32 %v1304_v7, %v1040_v25  ;;  %s1616_s10 = sld [smem:[#allocation7 + $0x15]] }
  0x53   :  { %v332_v62 = vmul.f32 %v1311_v51, %v984_v6  ;;  %v353_v5 = vadd.f32 %v349_v12, %v287_v63  ;;  %v337_v15 = vmul.f32 %v1325_v9, %v1053_v28  ;;  %v346_v31 = vmul.f32 %v1330_v55, %v1094_v44 }
  0x54   :  { %v275_v32 = vadd.f32 %v271_v30, %v266_v20  ;;  %v215_v50 = vadd.f32 %v211_v57, %v206_v37  ;;  %v1355_v49 = vstv %s1265_s18  ;;  %v1358_v25 = vstv %s1267_s20  ;;  %s1480_s18 = sld [smem:[#allocation7 + $0xe]]  ;;  %s1486_s20 = sld [smem:[#allocation7]] }
  0x55   :  { %v1361_v6 = vstv %s1283_s22  ;;  %v397_v42 = vadd.f32 %v1097_v45, %v353_v5  ;;  %v341_v18 = vadd.f32 %v337_v15, %v332_v62  ;;  %v159_v44 = vmul.f32 %v1355_v49, %v960_v1  ;;  %s1511_s22 = sld [smem:[#allocation7 + $0x7]] }
  0x56   :  { %v284_v28 = vadd.f32 %v280_v38, %v275_v32  ;;  %v219_v54 = vadd.f32 %v215_v50, %v157_v61  ;;  %v164_v29 = vmul.f32 %v974_v3, %v1358_v25  ;;  %v173_v56 = vmul.f32 %v1021_v17, %v1361_v6 }
  0x57   :  { %v1373_v57 = vstv %s1233_s2  ;;  %402 = vst [vmem:[#allocation2 + $0x19] sm:$0xf] %v397_v42  ;;  %v350_v63 = vadd.f32 %v346_v31, %v341_v18  ;;  %v1378_v20 = vstv %s1313_s6  ;;  %v1381_v30 = vstv %s1315_s7  ;;  %s1466_s2 = sld [smem:[#allocation7 + $0xf]]  ;;  %s1583_s6 = sld [smem:[#allocation7 + $0xb]] }
  0x58   :  { %v221_v12 = vmul.f32 %v1373_v57, %v967_v2  ;;  %v288_v1 = vadd.f32 %v284_v28, %v219_v54  ;;  %v168_v61 = vadd.f32 %v164_v29, %v159_v44  ;;  %v226_v3 = vmul.f32 %v991_v8, %v1378_v20  ;;  %s1594_s7 = sld [smem:[#allocation7 + $0xa]] }
  0x59   :  { %v235_v17 = vmul.f32 %v1028_v19, %v1381_v30  ;;  %v1388_v37 = vstv %s1332_s11  ;;  %v1391_v38 = vstv %s1338_s12  ;;  %v1394_v62 = vstv %s1340_s14  ;;  %s1622_s11 = sld [smem:[#allocation7 + $0x8]]  ;;  %s1635_s12 = sld [smem:[#allocation7 + $0x14]] }
  0x5a   :  { %v1397_v2 = vstv %s1220_s25  ;;  %v354_v5 = vadd.f32 %v350_v63, %v288_v1  ;;  %v177_v32 = vadd.f32 %v173_v56, %v168_v61  ;;  %v230_v15 = vadd.f32 %v226_v3, %v221_v12  ;;  %s1464_s25 = sld [smem:[#allocation7 + $0x3]]  ;;  %s1641_s14 = sld [smem:[#allocation8 + $0x2]] }
  0x5b   :  { %v290_v31 = vmul.f32 %v979_v4, %v1388_v37  ;;  %v295_v8 = vmul.f32 %v998_v10, %v1391_v38  ;;  %v304_v19 = vmul.f32 %v1009_v14, %v1394_v62  ;;  %v356_v50 = vmul.f32 %v1016_v16, %v1397_v2 }
  0x5c   :  { %v1408_v42 = vstv %s1350_s4  ;;  %v398_v28 = vadd.f32 %v1097_v45, %v354_v5  ;;  %v239_v18 = vadd.f32 %v235_v17, %v230_v15  ;;  %v1414_v54 = vstv %s1352_s16 }
  0x5d   :  { %v361_v44 = vmul.f32 %v1045_v26, %v1408_v42  ;;  %v299_v4 = vadd.f32 %v295_v8, %v290_v31  ;;  %v370_v10 = vmul.f32 %v1050_v27, %v1414_v54  ;;  %v1419_v29 = vstv %s1364_s15 }
  0x5e   :  { %v160_v14 = vmul.f32 %v1355_v49, %v1065_v33  ;;  %403 = vst [vmem:[#allocation2 + $0x21] sm:$0xf] %v398_v28  ;;  %v243_v16 = vadd.f32 %v239_v18, %v177_v32  ;;  %v165_v45 = vmul.f32 %v1070_v34, %v1358_v25  ;;  %v174_v26 = vmul.f32 %v1079_v39, %v1361_v6 }
  0x5f   :  { %v365_v56 = vadd.f32 %v361_v44, %v356_v50  ;;  %v308_v63 = vadd.f32 %v304_v19, %v299_v4  ;;  %v222_v12 = vmul.f32 %v1373_v57, %v1084_v40  ;;  %v227_v27 = vmul.f32 %v1089_v41, %v1378_v20  ;;  %v2060_v50 = vld [vmem:[#allocation13_spill] sm:$0xff]  ;;  %v2061_v44 = vld [vmem:[#allocation14_spill] sm:$0xff] }
  0x60   :  { %v236_v1 = vmul.f32 %v1102_v46, %v1381_v30  ;;  %v169_v61 = vadd.f32 %v165_v45, %v160_v14  ;;  %v291_v3 = vmul.f32 %v1107_v47, %v1388_v37  ;;  %v296_v34 = vmul.f32 %v1116_v52, %v1391_v38 }
  0x61   :  { %v374_v33 = vadd.f32 %v370_v10, %v365_v56  ;;  %v312_v17 = vadd.f32 %v308_v63, %v243_v16  ;;  %v231_v39 = vadd.f32 %v227_v27, %v222_v12  ;;  %v305_v5 = vmul.f32 %v1121_v53, %v1394_v62  ;;  %v2064_v56 = vld [vmem:[#allocation17_spill] sm:$0xff] }
  0x62   :  { %v357_v40 = vmul.f32 %v1132_v58, %v1397_v2  ;;  %v178_v41 = vadd.f32 %v174_v26, %v169_v61  ;;  %v300_v32 = vadd.f32 %v296_v34, %v291_v3  ;;  %v362_v46 = vmul.f32 %v1137_v59, %v1408_v42  ;;  %v2065_v61 = vld [vmem:[#allocation18_spill] sm:$0xff] }
  0x63   :  { %v371_v15 = vmul.f32 %v1148_v0, %v1414_v54  ;;  %v378_v47 = vadd.f32 %v374_v33, %v312_v17  ;;  %v240_v31 = vadd.f32 %v236_v1, %v231_v39  ;;  %v161_v52 = vmul.f32 %v1355_v49, %v1153_v11  ;;  %v2062_v11 = vld [vmem:[#allocation15_spill] sm:$0xff] }
  0x64   :  { %v166_v8 = vmul.f32 %v1162_v23, %v1358_v25  ;;  %v309_v53 = vadd.f32 %v305_v5, %v300_v32  ;;  %v366_v19 = vadd.f32 %v362_v46, %v357_v40  ;;  %v175_v58 = vmul.f32 %v1171_v36, %v1361_v6  ;;  %v2063_v23 = vld [vmem:[#allocation16_spill] sm:$0xff]  ;;  %v2066_v39 = vld [vmem:[#allocation19_spill] sm:$0xff]  ;;  %v2068_v32 = vld [vmem:[#allocation21_spill] sm:$0xff] }
  0x65   :  { %v223_v28 = vmul.f32 %v1373_v57, %v2060_v50  ;;  %v405_v59 = vadd.f32 %v1419_v29, %v378_v47  ;;  %v244_v18 = vadd.f32 %v240_v31, %v178_v41  ;;  %v228_v4 = vmul.f32 %v2061_v44, %v1378_v20  ;;  %v1529_v50 = vld [vmem:[#allocation2 + $0x31] sm:$0x1f] }
  0x66   :  { %v170_v0 = vadd.f32 %v166_v8, %v161_v52  ;;  %v375_v10 = vadd.f32 %v371_v15, %v366_v19  ;;  %v237_v14 = vmul.f32 %v2062_v11, %v1381_v30  ;;  %v292_v16 = vmul.f32 %v2063_v23, %v1388_v37  ;;  %v1503_v52 = vld [vmem:[#allocation2] sm:$0x1f] }
  0x67   :  { %v297_v36 = vmul.f32 %v2064_v56, %v1391_v38  ;;  %410 = vst [vmem:[#allocation2 + $0x39] sm:$0xf] %v405_v59  ;;  %v313_v45 = vadd.f32 %v309_v53, %v244_v18  ;;  %v232_v63 = vadd.f32 %v228_v4, %v223_v28  ;;  %v306_v12 = vmul.f32 %v1213_v13, %v1394_v62  ;;  %v2067_v13 = vld [vmem:[#allocation20_spill] sm:$0xff] }
  0x68   :  { %v179_v26 = vadd.f32 %v175_v58, %v170_v0  ;;  %v358_v1 = vmul.f32 %v1218_v21, %v1397_v2  ;;  %v363_v33 = vmul.f32 %v1226_v35, %v1408_v42  ;;  %v372_v3 = vmul.f32 %v2065_v61, %v1414_v54 }
  0x69   :  { %v301_v27 = vadd.f32 %v297_v36, %v292_v16  ;;  %v379_v34 = vadd.f32 %v375_v10, %v313_v45  ;;  %v241_v17 = vadd.f32 %v237_v14, %v232_v63  ;;  %v162_v5 = vmul.f32 %v1355_v49, %v2066_v39 }
  0x6a   :  { %v167_v40 = vmul.f32 %v2067_v13, %v1358_v25  ;;  %v367_v21 = vadd.f32 %v363_v33, %v358_v1  ;;  %v176_v35 = vmul.f32 %v2068_v32, %v1361_v6  ;;  %v224_v46 = vmul.f32 %v1373_v57, %v1263_v60 }
  0x6b   :  { %v310_v41 = vadd.f32 %v306_v12, %v301_v27  ;;  %v406_v15 = vadd.f32 %v1419_v29, %v379_v34  ;;  %v245_v49 = vadd.f32 %v241_v17, %v179_v26  ;;  %v229_v25 = vmul.f32 %v1276_v22, %v1378_v20 }
  0x6c   :  { %v171_v47 = vadd.f32 %v167_v40, %v162_v5  ;;  %v376_v31 = vadd.f32 %v372_v3, %v367_v21  ;;  %v238_v6 = vmul.f32 %v1281_v24, %v1381_v30  ;;  %v293_v60 = vmul.f32 %v1294_v48, %v1388_v37  ;;  %v1509_v24 = vld [vmem:[#allocation2 + $0x30] sm:$0x1f] }
  0x6d   :  { %v298_v57 = vmul.f32 %v1299_v43, %v1391_v38  ;;  %411 = vst [vmem:[#allocation2 + $0x41] sm:$0xf] %v406_v15  ;;  %v314_v22 = vadd.f32 %v310_v41, %v245_v49  ;;  %v233_v8 = vadd.f32 %v229_v25, %v224_v46  ;;  %v307_v53 = vmul.f32 %v1304_v7, %v1394_v62  ;;  %v1519_v38 = vld [vmem:[#allocation2 + $0x1] sm:$0x1f] }
  0x6e   :  { %v180_v20 = vadd.f32 %v176_v35, %v171_v47  ;;  %v359_v48 = vmul.f32 %v1311_v51, %v1397_v2  ;;  %v364_v30 = vmul.f32 %v1325_v9, %v1408_v42  ;;  %v373_v37 = vmul.f32 %v1330_v55, %v1414_v54  ;;  %v1539_v42 = vld [vmem:[#allocation2 + $0x8] sm:$0x1f]  ;;  %v1552_v44 = vld [vmem:[#allocation2 + $0x38] sm:$0x1f] }
  0x6f   :  { %v302_v43 = vadd.f32 %v298_v57, %v293_v60  ;;  %v380_v7 = vadd.f32 %v376_v31, %v314_v22  ;;  %v242_v62 = vadd.f32 %v238_v6, %v233_v8  ;;  %v1524_v19 = vstv %s1464_s25  ;;  %v1541_v54 = vld [vmem:[#allocation2 + $0x9] sm:$0x1f]  ;;  %v1568_v36 = vld [vmem:[#allocation2 + $0x39] sm:$0x1f] }
  0x70   :  { %v1527_v58 = vstv %s1466_s2  ;;  %v368_v9 = vadd.f32 %v364_v30, %v359_v48  ;;  %v426_v55 = vmul.f32 %v1524_v19, %v1503_v52  ;;  %v1547_v18 = vstv %s1478_s19 }
  0x71   :  { %v311_v51 = vadd.f32 %v307_v53, %v302_v43  ;;  %v432_v2 = vmul.f32 %v1527_v58, %v1509_v24  ;;  %v407_v28 = vadd.f32 %v1419_v29, %v380_v7  ;;  %v246_v59 = vadd.f32 %v242_v62, %v180_v20 }
  0x72   :  { %v1550_v0 = vstv %s1480_s18  ;;  %v377_v4 = vadd.f32 %v373_v37, %v368_v9  ;;  %v487_v11 = vmul.f32 %v1547_v18, %v1519_v38  ;;  %v1563_v16 = vstv %s1491_s23 }
  0x73   :  { %v437_v10 = vadd.f32 %v432_v2, %v426_v55  ;;  %v493_v14 = vmul.f32 %v1550_v0, %v1529_v50  ;;  %412 = vst [vmem:[#allocation2 + $0x49] sm:$0xf] %v407_v28  ;;  %v315_v23 = vadd.f32 %v311_v51, %v246_v59  ;;  %v1566_v56 = vstv %s1493_s24 }
  0x74   :  { %v1571_v45 = vstv %s1486_s20  ;;  %v563_v63 = vmul.f32 %v1563_v16, %v1539_v42  ;;  %v569_v12 = vmul.f32 %v1566_v56, %v1552_v44  ;;  %v1586_v33 = vstv %s1501_s13 }
  0x75   :  { %v498_v26 = vadd.f32 %v493_v14, %v487_v11  ;;  %v639_v27 = vmul.f32 %v1571_v45, %v1541_v54  ;;  %v381_v1 = vadd.f32 %v377_v4, %v315_v23  ;;  %v1589_v61 = vstv %s1507_s21  ;;  %v1683_v14 = vld [vmem:[#allocation2 + $0x8] sm:$0x1f] }
  0x76   :  { %v1592_v3 = vstv %s1511_s22  ;;  %v574_v17 = vadd.f32 %v569_v12, %v563_v63  ;;  %v645_v39 = vmul.f32 %v1586_v33, %v1568_v36  ;;  %v1606_v40 = vstv %s1533_s0  ;;  %v1692_v63 = vld [vmem:[#allocation2 + $0x38] sm:$0x1f]  ;;  %v1694_v12 = vld [vmem:[#allocation2 + $0x9] sm:$0x1f] }
  0x77   :  { %v503_v34 = vadd.f32 %v498_v26, %v437_v10  ;;  %v443_v5 = vmul.f32 %v1592_v3, %v1503_v52  ;;  %v408_v13 = vadd.f32 %v1419_v29, %v381_v1  ;;  %v1609_v41 = vstv %s1521_s26 }
  0x78   :  { %v1612_v21 = vstv %s1531_s1  ;;  %v650_v35 = vadd.f32 %v645_v39, %v639_v27  ;;  %v449_v46 = vmul.f32 %v1606_v40, %v1509_v24  ;;  %v509_v15 = vmul.f32 %v1609_v41, %v1519_v38  ;;  %v1703_v39 = vld [vmem:[#allocation2 + $0x10] sm:$0x1f] }
  0x79   :  { %v579_v32 = vadd.f32 %v574_v17, %v503_v34  ;;  %413 = vst [vmem:[#allocation2 + $0x51] sm:$0xf] %v408_v13  ;;  %v515_v29 = vmul.f32 %v1612_v21, %v1529_v50  ;;  %v1627_v49 = vstv %s1554_s28  ;;  %v1630_v47 = vstv %s1556_s29  ;;  %v1701_v17 = vld [vmem:[#allocation2 + $0x39] sm:$0x1f] }
  0x7a   :  { %v1633_v25 = vstv %s1543_s27  ;;  %v454_v6 = vadd.f32 %v449_v46, %v443_v5  ;;  %v585_v60 = vmul.f32 %v1627_v49, %v1539_v42  ;;  %v591_v57 = vmul.f32 %v1630_v47, %v1552_v44 }
  0x7b   :  { %v655_v31 = vadd.f32 %v650_v35, %v579_v32  ;;  %v520_v22 = vadd.f32 %v515_v29, %v509_v15  ;;  %v661_v20 = vmul.f32 %v1633_v25, %v1541_v54  ;;  %v1646_v8 = vstv %s1573_s30  ;;  %v1714_v35 = vld [vmem:[#allocation2 + $0x11] sm:$0x1f] }
  0x7c   :  { %v1649_v53 = vstv %s1575_s17  ;;  %v596_v48 = vadd.f32 %v591_v57, %v585_v60  ;;  %v667_v30 = vmul.f32 %v1646_v8, %v1568_v36  ;;  %v1655_v37 = vstv %s1583_s6 }
  0x7d   :  { %2069 = vst [vmem:[#allocation13_spill] sm:$0xff] %v1649_v53  ;;  %v705_v43 = vadd.f32 %v1589_v61, %v655_v31  ;;  %2070 = vst [vmem:[#allocation14_spill] sm:$0xff] %v1655_v37  ;;  %v525_v7 = vadd.f32 %v520_v22, %v454_v6  ;;  %v460_v62 = vmul.f32 %v1655_v37, %v1503_v52  ;;  %v1660_v51 = vstv %s1596_s8  ;;  %v1723_v6 = vld [vmem:[#allocation2 + $0x10] sm:$0x1f] }
  0x7e   :  { %2071 = vst [vmem:[#allocation15_spill] sm:$0xff] %v1660_v51  ;;  %v1663_v9 = vstv %s1594_s7  ;;  %v672_v55 = vadd.f32 %v667_v30, %v661_v20  ;;  %v466_v2 = vmul.f32 %v1660_v51, %v1509_v24  ;;  %v1673_v59 = vstv %s1602_s9 }
  0x7f   :  { %2072 = vst [vmem:[#allocation16_spill] sm:$0xff] %v1663_v9  ;;  %710 = vst [vmem:[%s2017_s5] sm:$0x1f] %v705_v43  ;;  %v531_v28 = vmul.f32 %v1663_v9, %v1519_v38  ;;  %v601_v52 = vadd.f32 %v596_v48, %v525_v7  ;;  %v537_v4 = vmul.f32 %v1673_v59, %v1529_v50  ;;  %v1678_v10 = vstv %s1614_s3  ;;  %v1733_v43 = vld [vmem:[#allocation2 + $0x11] sm:$0x1f]  ;;  %v1735_v48 = vld [vmem:[#allocation2 + $0x41] sm:$0x1f] }
  0x80   :  { %2073 = vst [vmem:[#allocation17_spill] sm:$0xff] %v1673_v59  ;;  %2074 = vst [vmem:[#allocation18_spill] sm:$0xff] %v1678_v10  ;;  %v1681_v11 = vstv %s1616_s10  ;;  %v471_v23 = vadd.f32 %v466_v2, %v460_v62  ;;  %v607_v24 = vmul.f32 %v1678_v10, %v1539_v42  ;;  %v1690_v26 = vstv %s1622_s11  ;;  %v1705_v42 = vld [vmem:[#allocation2 + $0x40] sm:$0x1f]  ;;  %v1744_v2 = vld [vmem:[#allocation2 + $0x18] sm:$0x1f] }
  0x81   :  { %2075 = vst [vmem:[#allocation19_spill] sm:$0xff] %v1681_v11  ;;  %v613_v38 = vmul.f32 %v1681_v11, %v1552_v44  ;;  %2076 = vst [vmem:[#allocation20_spill] sm:$0xff] %v1690_v26  ;;  %v677_v50 = vadd.f32 %v672_v55, %v601_v52  ;;  %v542_v27 = vadd.f32 %v537_v4, %v531_v28  ;;  %v1699_v34 = vstv %s1635_s12  ;;  %v1746_v28 = vld [vmem:[#allocation2 + $0x48] sm:$0x1f]  ;;  %v1810_v51 = vld [vmem:[#allocation2 + $0x51] sm:$0x1f] }
  0x82   :  { %v683_v1 = vmul.f32 %v1690_v26, %v1541_v54  ;;  %2077 = vst [vmem:[#allocation21_spill] sm:$0xff] %v1699_v34  ;;  %v689_v5 = vmul.f32 %v1699_v34, %v1568_v36  ;;  %v1710_v13 = vstv %s1641_s14  ;;  %v427_v32 = vmul.f32 %v1524_v19, %v1683_v14  ;;  %v1716_v54 = vld [vmem:[#allocation2 + $0x41] sm:$0x1f] }
  0x83   :  { %v618_v44 = vadd.f32 %v613_v38, %v607_v24  ;;  %2078 = vst [vmem:[#allocation22_spill] sm:$0xff] %v1710_v13  ;;  %v716_v46 = vadd.f32 %v1649_v53, %v677_v50  ;;  %v547_v15 = vadd.f32 %v542_v27, %v471_v23  ;;  %v433_v29 = vmul.f32 %v1527_v58, %v1692_v63  ;;  %v1725_v36 = vld [vmem:[#allocation2 + $0x40] sm:$0x1f]  ;;  %v1752_v38 = vld [vmem:[#allocation2 + $0x19] sm:$0x1f] }
  0x84   :  { %v488_v31 = vmul.f32 %v1547_v18, %v1694_v12  ;;  %v694_v60 = vadd.f32 %v689_v5, %v683_v1  ;;  %v494_v57 = vmul.f32 %v1550_v0, %v1701_v17  ;;  %v564_v22 = vmul.f32 %v1563_v16, %v1703_v39  ;;  %v1754_v50 = vld [vmem:[#allocation2 + $0x49] sm:$0x1f] }
  0x85   :  { %v570_v20 = vmul.f32 %v1566_v56, %v1705_v42  ;;  %835 = vst [vmem:[%s2017_s5 + $0x28] sm:$0x1f] %v716_v46  ;;  %v623_v30 = vadd.f32 %v618_v44, %v547_v15  ;;  %v438_v7 = vadd.f32 %v433_v29, %v427_v32  ;;  %v640_v62 = vmul.f32 %v1571_v45, %v1714_v35  ;;  %v1760_v32 = vld [vmem:[#allocation2 + $0x18] sm:$0x1f]  ;;  %v1762_v46 = vld [vmem:[#allocation2 + $0x48] sm:$0x1f] }
  0x86   :  { %v646_v55 = vmul.f32 %v1586_v33, %v1716_v54  ;;  %v499_v52 = vadd.f32 %v494_v57, %v488_v31  ;;  %v428_v23 = vmul.f32 %v1524_v19, %v1723_v6  ;;  %v434_v24 = vmul.f32 %v1527_v58, %v1725_v36 }
  0x87   :  { %v575_v4 = vadd.f32 %v570_v20, %v564_v22  ;;  %v699_v27 = vadd.f32 %v694_v60, %v623_v30  ;;  %v489_v44 = vmul.f32 %v1547_v18, %v1733_v43  ;;  %v495_v5 = vmul.f32 %v1550_v0, %v1735_v48  ;;  %v1768_v60 = vld [vmem:[#allocation2 + $0x19] sm:$0x1f]  ;;  %v1770_v22 = vld [vmem:[#allocation2 + $0x49] sm:$0x1f] }
  0x88   :  { %v651_v1 = vadd.f32 %v646_v55, %v640_v62  ;;  %v504_v15 = vadd.f32 %v499_v52, %v438_v7  ;;  %v439_v29 = vadd.f32 %v434_v24, %v428_v23  ;;  %v565_v31 = vmul.f32 %v1563_v16, %v1744_v2  ;;  %v1777_v55 = vld [vmem:[#allocation2 + $0x20] sm:$0x1f]  ;;  %v1779_v52 = vld [vmem:[#allocation2 + $0x50] sm:$0x1f] }
  0x89   :  { %v571_v57 = vmul.f32 %v1566_v56, %v1746_v28  ;;  %v728_v20 = vadd.f32 %v1710_v13, %v699_v27  ;;  %v500_v30 = vadd.f32 %v495_v5, %v489_v44  ;;  %v641_v62 = vmul.f32 %v1571_v45, %v1752_v38  ;;  %v1785_v27 = vld [vmem:[#allocation2 + $0x21] sm:$0x1f]  ;;  %v1787_v44 = vld [vmem:[#allocation2 + $0x51] sm:$0x1f] }
  0x8a   :  { %v647_v7 = vmul.f32 %v1586_v33, %v1754_v50  ;;  %v580_v23 = vadd.f32 %v575_v4, %v504_v15  ;;  %v429_v34 = vmul.f32 %v1524_v19, %v1760_v32  ;;  %v435_v26 = vmul.f32 %v1527_v58, %v1762_v46  ;;  %2079 = vst [vmem:[#allocation23_spill] sm:$0xff] %v1785_v27 }
  0x8b   :  { %v576_v24 = vadd.f32 %v571_v57, %v565_v31  ;;  %2080 = vst [vmem:[#allocation24_spill] sm:$0xff] %v1787_v44  ;;  %840 = vst [vmem:[%s2017_s5 + $0x50] sm:$0x1f] %v728_v20  ;;  %v505_v5 = vadd.f32 %v500_v30, %v439_v29  ;;  %v490_v4 = vmul.f32 %v1547_v18, %v1768_v60  ;;  %v1796_v31 = vld [vmem:[#allocation2 + $0x20] sm:$0x1f] }
  0x8c   :  { %v652_v13 = vadd.f32 %v647_v7, %v641_v62  ;;  %v496_v15 = vmul.f32 %v1550_v0, %v1770_v22  ;;  %v1798_v57 = vld [vmem:[#allocation2 + $0x50] sm:$0x1f]  ;;  %v656_v11 = vadd.f32 %v651_v1, %v580_v23  ;;  %v440_v10 = vadd.f32 %v435_v26, %v429_v34  ;;  %v1804_v29 = vld [vmem:[#allocation2 + $0x21] sm:$0x1f]  ;;  %v1812_v1 = vld [vmem:[#allocation2 + $0x28] sm:$0x1f] }
  0x8d   :  { %v566_v59 = vmul.f32 %v1563_v16, %v1777_v55  ;;  %v572_v20 = vmul.f32 %v1566_v56, %v1779_v52  ;;  %v581_v30 = vadd.f32 %v576_v24, %v505_v5  ;;  %v642_v7 = vmul.f32 %v1571_v45, %v1785_v27  ;;  %v1814_v26 = vld [vmem:[#allocation2 + $0x58] sm:$0x1f]  ;;  %v1821_v5 = vld [vmem:[#allocation2 + $0x29] sm:$0x1f] }
  0x8e   :  { %v501_v62 = vadd.f32 %v496_v15, %v490_v4  ;;  %v648_v9 = vmul.f32 %v1586_v33, %v1787_v44  ;;  %v706_v34 = vadd.f32 %v1589_v61, %v656_v11  ;;  %v430_v37 = vmul.f32 %v1524_v19, %v1796_v31  ;;  %v1823_v4 = vld [vmem:[#allocation2 + $0x59] sm:$0x1f] }
  0x8f   :  { %v577_v23 = vadd.f32 %v572_v20, %v566_v59  ;;  %v436_v24 = vmul.f32 %v1527_v58, %v1798_v57  ;;  %v657_v15 = vadd.f32 %v652_v13, %v581_v30  ;;  %v491_v53 = vmul.f32 %v1547_v18, %v1804_v29 }
  0x90   :  { %v506_v44 = vadd.f32 %v501_v62, %v440_v10  ;;  %v653_v27 = vadd.f32 %v648_v9, %v642_v7  ;;  %711 = vst [vmem:[%s2017_s5 + $0x8] sm:$0x1f] %v706_v34  ;;  %v497_v19 = vmul.f32 %v1550_v0, %v1810_v51  ;;  %v567_v58 = vmul.f32 %v1563_v16, %v1812_v1 }
  0x91   :  { %v441_v59 = vadd.f32 %v436_v24, %v430_v37  ;;  %v573_v11 = vmul.f32 %v1566_v56, %v1814_v26  ;;  %v707_v10 = vadd.f32 %v1589_v61, %v657_v15  ;;  %v643_v18 = vmul.f32 %v1571_v45, %v1821_v5 }
  0x92   :  { %v582_v9 = vadd.f32 %v577_v23, %v506_v44  ;;  %v649_v13 = vmul.f32 %v1586_v33, %v1823_v4  ;;  %v502_v20 = vadd.f32 %v497_v19, %v491_v53  ;;  %v444_v0 = vmul.f32 %v1592_v3, %v1683_v14 }
  0x93   :  { %v578_v37 = vadd.f32 %v573_v11, %v567_v58  ;;  %v450_v16 = vmul.f32 %v1606_v40, %v1692_v63  ;;  %712 = vst [vmem:[%s2017_s5 + $0x10] sm:$0x1f] %v707_v10  ;;  %v510_v45 = vmul.f32 %v1609_v41, %v1694_v12  ;;  %v516_v33 = vmul.f32 %v1612_v21, %v1701_v17 }
  0x94   :  { %v658_v56 = vadd.f32 %v653_v27, %v582_v9  ;;  %v654_v44 = vadd.f32 %v649_v13, %v643_v18  ;;  %v507_v53 = vadd.f32 %v502_v20, %v441_v59  ;;  %v586_v62 = vmul.f32 %v1627_v49, %v1703_v39 }
  0x95   :  { %v455_v30 = vadd.f32 %v450_v16, %v444_v0  ;;  %v592_v7 = vmul.f32 %v1630_v47, %v1705_v42  ;;  %v521_v23 = vadd.f32 %v516_v33, %v510_v45  ;;  %v662_v27 = vmul.f32 %v1633_v25, %v1714_v35 }
  0x96   :  { %v708_v34 = vadd.f32 %v1589_v61, %v658_v56  ;;  %v668_v24 = vmul.f32 %v1646_v8, %v1716_v54  ;;  %v583_v15 = vadd.f32 %v578_v37, %v507_v53  ;;  %v445_v59 = vmul.f32 %v1592_v3, %v1723_v6 }
  0x97   :  { %v597_v19 = vadd.f32 %v592_v7, %v586_v62  ;;  %v451_v58 = vmul.f32 %v1606_v40, %v1725_v36  ;;  %v526_v11 = vadd.f32 %v521_v23, %v455_v30  ;;  %v511_v9 = vmul.f32 %v1609_v41, %v1733_v43 }
  0x98   :  { %713 = vst [vmem:[%s2017_s5 + $0x18] sm:$0x1f] %v708_v34  ;;  %v673_v10 = vadd.f32 %v668_v24, %v662_v27  ;;  %v517_v18 = vmul.f32 %v1612_v21, %v1735_v48  ;;  %v659_v13 = vadd.f32 %v654_v44, %v583_v15  ;;  %v587_v37 = vmul.f32 %v1627_v49, %v1744_v2 }
  0x99   :  { %v456_v20 = vadd.f32 %v451_v58, %v445_v59  ;;  %v593_v0 = vmul.f32 %v1630_v47, %v1746_v28  ;;  %v602_v16 = vadd.f32 %v597_v19, %v526_v11  ;;  %v663_v45 = vmul.f32 %v1633_v25, %v1752_v38  ;;  %v2081_v59 = vld [vmem:[#allocation13_spill] sm:$0xff] }
  0x9a   :  { %v522_v56 = vadd.f32 %v517_v18, %v511_v9  ;;  %v669_v33 = vmul.f32 %v1646_v8, %v1754_v50  ;;  %v709_v53 = vadd.f32 %v1589_v61, %v659_v13  ;;  %v446_v44 = vmul.f32 %v1592_v3, %v1760_v32  ;;  %v2083_v18 = vld [vmem:[#allocation24_spill] sm:$0xff] }
  0x9b   :  { %v598_v30 = vadd.f32 %v593_v0, %v587_v37  ;;  %v452_v62 = vmul.f32 %v1606_v40, %v1762_v46  ;;  %v678_v7 = vadd.f32 %v673_v10, %v602_v16  ;;  %v512_v27 = vmul.f32 %v1609_v41, %v1768_v60  ;;  %v2082_v10 = vld [vmem:[#allocation23_spill] sm:$0xff] }
  0x9c   :  { %v527_v34 = vadd.f32 %v522_v56, %v456_v20  ;;  %v674_v23 = vadd.f32 %v669_v33, %v663_v45  ;;  %714 = vst [vmem:[%s2017_s5 + $0x20] sm:$0x1f] %v709_v53  ;;  %v518_v61 = vmul.f32 %v1612_v21, %v1770_v22  ;;  %v588_v15 = vmul.f32 %v1627_v49, %v1777_v55 }
  0x9d   :  { %v457_v24 = vadd.f32 %v452_v62, %v446_v44  ;;  %v594_v19 = vmul.f32 %v1630_v47, %v1779_v52  ;;  %v717_v58 = vadd.f32 %v2081_v59, %v678_v7  ;;  %v664_v9 = vmul.f32 %v1633_v25, %v2082_v10 }
  0x9e   :  { %v603_v11 = vadd.f32 %v598_v30, %v527_v34  ;;  %v670_v13 = vmul.f32 %v1646_v8, %v2083_v18  ;;  %v523_v20 = vadd.f32 %v518_v61, %v512_v27  ;;  %v447_v0 = vmul.f32 %v1592_v3, %v1796_v31  ;;  %v2085_v61 = vld [vmem:[#allocation15_spill] sm:$0xff] }
  0x9f   :  { %v599_v37 = vadd.f32 %v594_v19, %v588_v15  ;;  %v453_v16 = vmul.f32 %v1606_v40, %v1798_v57  ;;  %836 = vst [vmem:[%s2017_s5 + $0x30] sm:$0x1f] %v717_v58  ;;  %v513_v33 = vmul.f32 %v1609_v41, %v1804_v29  ;;  %v519_v53 = vmul.f32 %v1612_v21, %v1810_v51  ;;  %v2084_v21 = vld [vmem:[#allocation14_spill] sm:$0xff]  ;;  %v2086_v19 = vld [vmem:[#allocation16_spill] sm:$0xff]  ;;  %v2087_v58 = vld [vmem:[#allocation17_spill] sm:$0xff] }
  0xa0   :  { %v679_v56 = vadd.f32 %v674_v23, %v603_v11  ;;  %v675_v45 = vadd.f32 %v670_v13, %v664_v9  ;;  %v528_v30 = vadd.f32 %v523_v20, %v457_v24  ;;  %v589_v3 = vmul.f32 %v1627_v49, %v1812_v1  ;;  %v2088_v13 = vld [vmem:[#allocation18_spill] sm:$0xff]  ;;  %v2089_v20 = vld [vmem:[#allocation19_spill] sm:$0xff] }
  0xa1   :  { %v458_v44 = vadd.f32 %v453_v16, %v447_v0  ;;  %v595_v40 = vmul.f32 %v1630_v47, %v1814_v26  ;;  %v524_v7 = vadd.f32 %v519_v53, %v513_v33  ;;  %v665_v34 = vmul.f32 %v1633_v25, %v1821_v5  ;;  %v2090_v16 = vld [vmem:[#allocation20_spill] sm:$0xff]  ;;  %v2091_v33 = vld [vmem:[#allocation21_spill] sm:$0xff] }
  0xa2   :  { %v718_v62 = vadd.f32 %v2081_v59, %v679_v56  ;;  %v671_v41 = vmul.f32 %v1646_v8, %v1823_v4  ;;  %v604_v23 = vadd.f32 %v599_v37, %v528_v30  ;;  %v461_v24 = vmul.f32 %v2084_v21, %v1683_v14 }
  0xa3   :  { %v600_v27 = vadd.f32 %v595_v40, %v589_v3  ;;  %v467_v49 = vmul.f32 %v2085_v61, %v1692_v63  ;;  %v529_v47 = vadd.f32 %v524_v7, %v458_v44  ;;  %v532_v25 = vmul.f32 %v2086_v19, %v1694_v12 }
  0xa4   :  { %837 = vst [vmem:[%s2017_s5 + $0x38] sm:$0x1f] %v718_v62  ;;  %v676_v15 = vadd.f32 %v671_v41, %v665_v34  ;;  %v538_v8 = vmul.f32 %v2087_v58, %v1701_v17  ;;  %v680_v11 = vadd.f32 %v675_v45, %v604_v23  ;;  %v608_v14 = vmul.f32 %v2088_v13, %v1703_v39 }
  0xa5   :  { %v472_v9 = vadd.f32 %v467_v49, %v461_v24  ;;  %v614_v63 = vmul.f32 %v2089_v20, %v1705_v42  ;;  %v605_v37 = vadd.f32 %v600_v27, %v529_v47  ;;  %v684_v56 = vmul.f32 %v2090_v16, %v1714_v35  ;;  %v2092_v24 = vld [vmem:[#allocation22_spill] sm:$0xff] }
  0xa6   :  { %v543_v0 = vadd.f32 %v538_v8, %v532_v25  ;;  %v690_v53 = vmul.f32 %v2091_v33, %v1716_v54  ;;  %v719_v12 = vadd.f32 %v2081_v59, %v680_v11  ;;  %v462_v17 = vmul.f32 %v2084_v21, %v1723_v6 }
  0xa7   :  { %v619_v30 = vadd.f32 %v614_v63, %v608_v14  ;;  %v468_v39 = vmul.f32 %v2085_v61, %v1725_v36  ;;  %v681_v45 = vadd.f32 %v676_v15, %v605_v37  ;;  %v533_v3 = vmul.f32 %v2086_v19, %v1733_v43 }
  0xa8   :  { %v548_v44 = vadd.f32 %v543_v0, %v472_v9  ;;  %v695_v42 = vadd.f32 %v690_v53, %v684_v56  ;;  %838 = vst [vmem:[%s2017_s5 + $0x40] sm:$0x1f] %v719_v12  ;;  %v539_v54 = vmul.f32 %v2087_v58, %v1735_v48  ;;  %v609_v6 = vmul.f32 %v2088_v13, %v1744_v2 }
  0xa9   :  { %v473_v35 = vadd.f32 %v468_v39, %v462_v17  ;;  %v615_v36 = vmul.f32 %v2089_v20, %v1746_v28  ;;  %v720_v40 = vadd.f32 %v2081_v59, %v681_v45  ;;  %v685_v43 = vmul.f32 %v2090_v16, %v1752_v38 }
  0xaa   :  { %v624_v62 = vadd.f32 %v619_v30, %v548_v44  ;;  %v691_v7 = vmul.f32 %v2091_v33, %v1754_v50  ;;  %v544_v34 = vadd.f32 %v539_v54, %v533_v3  ;;  %v463_v48 = vmul.f32 %v2084_v21, %v1760_v32 }
  0xab   :  { %v620_v41 = vadd.f32 %v615_v36, %v609_v6  ;;  %v469_v2 = vmul.f32 %v2085_v61, %v1762_v46  ;;  %839 = vst [vmem:[%s2017_s5 + $0x48] sm:$0x1f] %v720_v40  ;;  %v534_v38 = vmul.f32 %v2086_v19, %v1768_v60  ;;  %v540_v50 = vmul.f32 %v2087_v58, %v1770_v22 }
  0xac   :  { %v700_v28 = vadd.f32 %v695_v42, %v624_v62  ;;  %v696_v59 = vadd.f32 %v691_v7, %v685_v43  ;;  %v549_v23 = vadd.f32 %v544_v34, %v473_v35  ;;  %v610_v32 = vmul.f32 %v2088_v13, %v1777_v55 }
  0xad   :  { %v474_v27 = vadd.f32 %v469_v2, %v463_v48  ;;  %v616_v46 = vmul.f32 %v2089_v20, %v1779_v52  ;;  %v545_v47 = vadd.f32 %v540_v50, %v534_v38  ;;  %v686_v15 = vmul.f32 %v2090_v16, %v2082_v10 }
  0xae   :  { %v729_v49 = vadd.f32 %v2092_v24, %v700_v28  ;;  %v692_v60 = vmul.f32 %v2091_v33, %v2083_v18  ;;  %v625_v25 = vadd.f32 %v620_v41, %v549_v23  ;;  %v464_v22 = vmul.f32 %v2084_v21, %v1796_v31 }
  0xaf   :  { %v621_v8 = vadd.f32 %v616_v46, %v610_v32  ;;  %v470_v55 = vmul.f32 %v2085_v61, %v1798_v57  ;;  %v550_v52 = vadd.f32 %v545_v47, %v474_v27  ;;  %v535_v10 = vmul.f32 %v2086_v19, %v1804_v29 }
  0xb0   :  { %841 = vst [vmem:[%s2017_s5 + $0x58] sm:$0x1f] %v729_v49  ;;  %v697_v11 = vadd.f32 %v692_v60, %v686_v15  ;;  %v541_v18 = vmul.f32 %v2087_v58, %v1810_v51  ;;  %v701_v9 = vadd.f32 %v696_v59, %v625_v25  ;;  %v611_v31 = vmul.f32 %v2088_v13, %v1812_v1 }
  0xb1   :  { %v475_v14 = vadd.f32 %v470_v55, %v464_v22  ;;  %v617_v57 = vmul.f32 %v2089_v20, %v1814_v26  ;;  %v626_v21 = vadd.f32 %v621_v8, %v550_v52  ;;  %v687_v63 = vmul.f32 %v2090_v16, %v1821_v5 }
  0xb2   :  { %v546_v61 = vadd.f32 %v541_v18, %v535_v10  ;;  %v693_v37 = vmul.f32 %v2091_v33, %v1823_v4  ;;  %v730_v29 = vadd.f32 %v2092_v24, %v701_v9 }
  0xb3   :  { %v622_v19 = vadd.f32 %v617_v57, %v611_v31  ;;  %v702_v51 = vadd.f32 %v697_v11, %v626_v21 }
  0xb4   :  { %v551_v58 = vadd.f32 %v546_v61, %v475_v14  ;;  %842 = vst [vmem:[%s2017_s5 + $0x60] sm:$0x1f] %v730_v29  ;;  %v698_v13 = vadd.f32 %v693_v37, %v687_v63 }
  0xb5   :  { %v731_v1 = vadd.f32 %v2092_v24, %v702_v51 }
  0xb6   :  { %v627_v26 = vadd.f32 %v622_v19, %v551_v58 }
  0xb7   :  { %843 = vst [vmem:[%s2017_s5 + $0x68] sm:$0x1f] %v731_v1 }
  0xb8   :  { %v703_v5 = vadd.f32 %v698_v13, %v627_v26 }
  0xba   :  { %v732_v4 = vadd.f32 %v2092_v24, %v703_v5 }
  0xbc   :  { %844 = vst [vmem:[%s2017_s5 + $0x70] sm:$0x1f] %v732_v4 }
  0xbd   :  { %743 = vsyncpa [#allocation4], 1 }
  0xbe   :  { %744 = vsyncpa [#allocation6], 1 }
  0xbf   :  { %745 = vsyncpa [#allocation9], 1 }

</bundles_post_ra>
